<compile_context>
chip_gen: v7x
topology: tpu7x:2x2x1
jax: 0.10.0
libtpu: 0.0.40
codegen_flags: <defaults>
</compile_context>

<pallas_src>
import functools

import jax
import jax.numpy as jnp
from jax.experimental import pallas as pl
from jax.experimental.pallas import tpu as pltpu


def _round_up(x, m):
    return (x + m - 1) // m * m


# ----------------------------------------------------------------------------
# Kernel 1: adain_code_generator_seperate
#   shared_code -> Linear(512,512) -> LeakyReLU(0.2)
#               -> [fc_mean | fc_var] (fused single GEMM) -> ReLU on var half
# Outputs are channel-padded to Cp lanes (padded channels are zero).
# ----------------------------------------------------------------------------
def _adain_code_kernel(sc_ref, w1_ref, b1_ref, wmv_ref, bmv_ref,
                       mean_ref, var_ref, *, Cp):
    h = jnp.dot(sc_ref[...], w1_ref[...], preferred_element_type=jnp.float32)
    h = h + b1_ref[...]
    h = jnp.where(h >= 0, h, 0.2 * h)                      # LeakyReLU(0.2)
    mv = jnp.dot(h, wmv_ref[...], preferred_element_type=jnp.float32)
    mv = mv + bmv_ref[...]
    mean_ref[...] = mv[:, :Cp]
    var_ref[...] = jnp.maximum(mv[:, Cp:], 0.0)            # ReLU on fc_var


# ----------------------------------------------------------------------------
# Kernel 2 (hot path): one im2col GEMM per sample + InstanceNorm3d
# (affine=False) + AdaIN modulation + alpha blend + LeakyReLU(0.2).
# Grid = (N,); each step handles one sample, fully lane-dense.
# ----------------------------------------------------------------------------
def _conv_in_adain_kernel(alpha_ref, p_ref, w_ref, b_ref, mean_ref, var_ref,
                          o_ref):
    # p_ref: (S, Kp) bf16 im2col patches of one sample
    # w_ref: (Kp, Cp) bf16 conv weights;  b/mean/var: (1, Cp) f32
    # o_ref: (S, Cp) f32
    acc = jnp.dot(p_ref[...], w_ref[...], preferred_element_type=jnp.float32)
    acc = acc + b_ref[...]

    # InstanceNorm3d: per-channel (lane) stats over the spatial axis.
    mu = jnp.mean(acc, axis=0, keepdims=True)               # (1, Cp)
    cen = acc - mu
    var = jnp.mean(cen * cen, axis=0, keepdims=True)        # biased variance
    xn = cen * jax.lax.rsqrt(var + 1e-5)

    # AdaIN: sigma_y * xn + mean_y, alpha blend with xn, LeakyReLU(0.2)
    alpha = alpha_ref[0]
    x_out = var_ref[...] * xn + mean_ref[...]
    x_out = x_out * alpha + xn * (1.0 - alpha)
    o_ref[...] = jnp.where(x_out >= 0, x_out, 0.2 * x_out).astype(o_ref.dtype)


# ----------------------------------------------------------------------------
# Parameters (deterministic synthetic init — shapes per module __init__)
# ----------------------------------------------------------------------------
def init_params(key, in_ch, out_ch):
    ks = jax.random.split(key, 8)
    return {
        # Conv3d(in_ch, out_ch, 3): stored as (3,3,3, Cin, Cout)
        "conv_w": jax.random.normal(ks[0], (3, 3, 3, in_ch, out_ch), jnp.float32) * 0.1,
        "conv_b": jax.random.normal(ks[1], (out_ch,), jnp.float32) * 0.1,
        # basic_fc: Linear(512,512) stored as (in, out)
        "w1": jax.random.normal(ks[2], (512, 512), jnp.float32) * 0.02,
        "b1": jax.random.normal(ks[3], (512,), jnp.float32) * 0.02,
        # fc_mean / fc_var: Linear(512, out_ch) stored as (in, out)
        "wm": jax.random.normal(ks[4], (512, out_ch), jnp.float32) * 0.02,
        "bm": jax.random.normal(ks[5], (out_ch,), jnp.float32) * 0.02,
        "wv": jax.random.normal(ks[6], (512, out_ch), jnp.float32) * 0.02,
        "bv": jax.random.normal(ks[7], (out_ch,), jnp.float32) * 0.02,
    }


# ----------------------------------------------------------------------------
# Wrapper
# ----------------------------------------------------------------------------
def inconv_forward(x_nchw, shared_code, alpha, params):
    N, Cin, D, H, W = x_nchw.shape
    Cout = params["conv_w"].shape[-1]
    S = D * H * W
    K = 27 * Cin
    Kp = _round_up(K, 128)           # padded contraction dim
    Cp = _round_up(Cout, 128)        # padded channel dim (lane-dense)

    # ---- AdaIN code generator: fuse fc_mean | fc_var into one (512, 2*Cp) GEMM
    wmv = jnp.zeros((512, 2 * Cp), jnp.float32)
    wmv = wmv.at[:, :Cout].set(params["wm"]).at[:, Cp:Cp + Cout].set(params["wv"])
    bmv = jnp.zeros((1, 2 * Cp), jnp.float32)
    bmv = bmv.at[0, :Cout].set(params["bm"]).at[0, Cp:Cp + Cout].set(params["bv"])

    mean_y, var_y = pl.pallas_call(
        functools.partial(_adain_code_kernel, Cp=Cp),
        out_shape=(jax.ShapeDtypeStruct((N, Cp), jnp.float32),
                   jax.ShapeDtypeStruct((N, Cp), jnp.float32)),
    )(shared_code, params["w1"], params["b1"].reshape(1, 512), wmv, bmv)

    # ---- im2col in the wrapper (XLA): lane-dense (N, S, Kp) bf16 patch matrix
    x = jnp.transpose(x_nchw, (0, 2, 3, 4, 1))               # NCDHW -> NDHWC
    xp = jnp.pad(x, ((0, 0), (1, 1), (1, 1), (1, 1), (0, 0)))
    taps = [xp[:, kd:kd + D, kh:kh + H, kw:kw + W, :]
            for kd in range(3) for kh in range(3) for kw in range(3)]
    patches = jnp.concatenate(taps, axis=-1).reshape(N, S, K)
    patches = jnp.pad(patches, ((0, 0), (0, 0), (0, Kp - K))).astype(jnp.bfloat16)

    # ---- conv weights as one dense 2-D tile (Kp, Cp) bf16; bias (1, Cp) f32
    w2d = params["conv_w"].reshape(K, Cout)
    w2d = jnp.pad(w2d, ((0, Kp - K), (0, Cp - Cout))).astype(jnp.bfloat16)
    bias = jnp.pad(params["conv_b"], (0, Cp - Cout)).reshape(1, Cp)

    alpha_arr = jnp.asarray([alpha], jnp.float32)

    out = pl.pallas_call(
        _conv_in_adain_kernel,
        grid=(N,),
        in_specs=[
            pl.BlockSpec(memory_space=pltpu.MemorySpace.SMEM),     # alpha scalar
            pl.BlockSpec((None, S, Kp), lambda n: (n, 0, 0)),      # patches (1 sample)
            pl.BlockSpec((Kp, Cp), lambda n: (0, 0)),              # conv weight tile
            pl.BlockSpec((1, Cp), lambda n: (0, 0)),               # conv bias
            pl.BlockSpec((1, Cp), lambda n: (n, 0)),               # mean_y row n
            pl.BlockSpec((1, Cp), lambda n: (n, 0)),               # var_y row n
        ],
        out_specs=pl.BlockSpec((None, S, Cp), lambda n: (n, 0, 0)),
        out_shape=jax.ShapeDtypeStruct((N, S, Cp), jnp.float32),
        compiler_params=pltpu.CompilerParams(
            dimension_semantics=("parallel",)),                    # batch is independent
    )(alpha_arr, patches, w2d, bias, mean_y, var_y)

    # (N, S, Cp) -> strip channel padding -> NDHWC -> NCDHW
    out = out[:, :, :Cout].reshape(N, D, H, W, Cout)
    return jnp.transpose(out, (0, 4, 1, 2, 3))


# ----------------------------------------------------------------------------
# Pure-JAX reference. The conv operands are cast to bf16 (f32 accumulation) to
# match the kernel's requested mixed-precision GEMM; all other math is f32.
# ----------------------------------------------------------------------------
def inconv_reference(x, sc, alpha, p):
    w = jnp.transpose(p["conv_w"], (4, 3, 0, 1, 2))          # (Cout, Cin, 3,3,3)
    y = jax.lax.conv_general_dilated(
        x.astype(jnp.bfloat16), w.astype(jnp.bfloat16),
        window_strides=(1, 1, 1), padding=[(1, 1)] * 3,
        dimension_numbers=("NCDHW", "OIDHW", "NCDHW"),
        preferred_element_type=jnp.float32)
    y = y + p["conv_b"][None, :, None, None, None]
    mu = jnp.mean(y, axis=(2, 3, 4), keepdims=True)
    var = jnp.var(y, axis=(2, 3, 4), keepdims=True)
    yn = (y - mu) * jax.lax.rsqrt(var + 1e-5)
    h = sc @ p["w1"] + p["b1"]
    h = jnp.where(h >= 0, h, 0.2 * h)
    m = h @ p["wm"] + p["bm"]
    v = jnp.maximum(h @ p["wv"] + p["bv"], 0.0)
    m = m[:, :, None, None, None]
    v = v[:, :, None, None, None]
    out = v * yn + m
    out = out * alpha + yn * (1.0 - alpha)
    return jnp.where(out >= 0, out, 0.2 * out)


if __name__ == "__main__":
    key = jax.random.PRNGKey(0)
    k_x, k_sc, k_p = jax.random.split(key, 3)

    N, IN_CH, OUT_CH = 2, 4, 8
    D = H = W = 8                       # S = D*H*W = 512 (lane-friendly)
    alpha = 0.7

    x = jax.random.normal(k_x, (N, IN_CH, D, H, W), jnp.float32)
    shared_code = jax.random.normal(k_sc, (N, 512), jnp.float32)
    params = init_params(k_p, IN_CH, OUT_CH)

    out = inconv_forward(x, shared_code, alpha, params)
    out = jax.block_until_ready(out)

    ref = jax.block_until_ready(inconv_reference(x, shared_code, alpha, params))
    assert out.shape == (N, OUT_CH, D, H, W)
    # bf16 GEMM operands (f32 accumulation) -> relaxed tolerance vs f32 reference
    assert jnp.allclose(out, ref, rtol=2e-2, atol=2e-2), float(
        jnp.max(jnp.abs(out - ref)))

    print("KERNEL_OK")
</pallas_src>

<mosaic_0001>
module attributes {stable_mosaic.version = 11 : i64} {
  func.func @_adain_code_kernel(%arg0: memref<2x512xf32, #tpu.memory_space<vmem>>, %arg1: memref<512x512xf32, #tpu.memory_space<vmem>>, %arg2: memref<1x512xf32, #tpu.memory_space<vmem>>, %arg3: memref<512x256xf32, #tpu.memory_space<vmem>>, %arg4: memref<1x256xf32, #tpu.memory_space<vmem>>, %arg5: memref<2x128xf32, #tpu.memory_space<vmem>>, %arg6: memref<2x128xf32, #tpu.memory_space<vmem>>) attributes {dimension_semantics = [], scalar_prefetch = 0 : i64, scratch_operands = 0 : i64, tpu.core_type = #tpu.core_type<tc>} {
    %c0 = arith.constant 0 : index
    %c0_0 = arith.constant 0 : index
    %0 = vector.load %arg0[%c0, %c0_0] : memref<2x512xf32, #tpu.memory_space<vmem>>, vector<2x512xf32>
    %c0_1 = arith.constant 0 : index
    %c0_2 = arith.constant 0 : index
    %1 = vector.load %arg1[%c0_1, %c0_2] : memref<512x512xf32, #tpu.memory_space<vmem>>, vector<512x512xf32>
    %cst = arith.constant dense<0.000000e+00> : vector<2x512xf32>
    %2 = tpu.matmul %0, %1, %cst {dimension_numbers = #tpu.dot_dimension_numbers<[1], [0], [0], [1], [0, 0, 1, 1], [], []>} : vector<2x512xf32>, vector<512x512xf32>, vector<2x512xf32> -> vector<2x512xf32>
    %c0_3 = arith.constant 0 : index
    %c0_4 = arith.constant 0 : index
    %3 = vector.load %arg2[%c0_3, %c0_4] : memref<1x512xf32, #tpu.memory_space<vmem>>, vector<1x512xf32>
    %4 = vector.broadcast %3 : vector<1x512xf32> to vector<2x512xf32>
    %5 = arith.addf %2, %4 : vector<2x512xf32>
    %cst_5 = arith.constant 0.000000e+00 : f32
    %6 = vector.broadcast %cst_5 : f32 to vector<2x512xf32>
    %7 = arith.cmpf oge, %5, %6 : vector<2x512xf32>
    %cst_6 = arith.constant 2.000000e-01 : f32
    %8 = vector.broadcast %cst_6 : f32 to vector<2x512xf32>
    %9 = arith.mulf %8, %5 : vector<2x512xf32>
    %10 = arith.select %7, %5, %9 : vector<2x512xi1>, vector<2x512xf32>
    %c0_7 = arith.constant 0 : index
    %c0_8 = arith.constant 0 : index
    %11 = vector.load %arg3[%c0_7, %c0_8] : memref<512x256xf32, #tpu.memory_space<vmem>>, vector<512x256xf32>
    %cst_9 = arith.constant dense<0.000000e+00> : vector<2x256xf32>
    %12 = tpu.matmul %10, %11, %cst_9 {dimension_numbers = #tpu.dot_dimension_numbers<[1], [0], [0], [1], [0, 0, 1, 1], [], []>} : vector<2x512xf32>, vector<512x256xf32>, vector<2x256xf32> -> vector<2x256xf32>
    %c0_10 = arith.constant 0 : index
    %c0_11 = arith.constant 0 : index
    %13 = vector.load %arg4[%c0_10, %c0_11] : memref<1x256xf32, #tpu.memory_space<vmem>>, vector<1x256xf32>
    %14 = vector.broadcast %13 : vector<1x256xf32> to vector<2x256xf32>
    %15 = arith.addf %12, %14 : vector<2x256xf32>
    %16 = vector.extract_strided_slice %15 {offsets = [0, 0], sizes = [2, 128], strides = [1, 1]} : vector<2x256xf32> to vector<2x128xf32>
    %c0_12 = arith.constant 0 : index
    %c0_13 = arith.constant 0 : index
    %17 = vector.load %arg5[%c0_12, %c0_13] : memref<2x128xf32, #tpu.memory_space<vmem>>, vector<2x128xf32>
    tpu.vector_store %arg5[%c0_12, %c0_13], %16 {strides = array<i32>} : memref<2x128xf32, #tpu.memory_space<vmem>>, vector<2x128xf32>,
    %18 = vector.extract_strided_slice %15 {offsets = [0, 128], sizes = [2, 128], strides = [1, 1]} : vector<2x256xf32> to vector<2x128xf32>
    %cst_14 = arith.constant 0.000000e+00 : f32
    %19 = vector.broadcast %cst_14 : f32 to vector<2x128xf32>
    %20 = arith.maximumf %18, %19 : vector<2x128xf32>
    %c0_15 = arith.constant 0 : index
    %c0_16 = arith.constant 0 : index
    %21 = vector.load %arg6[%c0_15, %c0_16] : memref<2x128xf32, #tpu.memory_space<vmem>>, vector<2x128xf32>
    tpu.vector_store %arg6[%c0_15, %c0_16], %20 {strides = array<i32>} : memref<2x128xf32, #tpu.memory_space<vmem>>, vector<2x128xf32>,
    return
  }
}

</mosaic_0001>

<bundles_post_ra>
// kernel: tpu_custom_call.1
= control target key start
LH: loop header
LB: loop body
LE: loop exit
PB: predicated region body
PF: predicated region fallthrough
CT: control target
= control target key end

     0   :  { %12 = vsyncpa [#allocation3], 0  ;;  %s1652_s0 = inlined_call_operand.hbm [shape: f32[2,512], index: 0, kind: input, shape index: {}]   ;;  %s1653_s1 = inlined_call_operand.hbm [shape: f32[512,512], index: 1, kind: input, shape index: {}]   ;;  %s1654_s2 = inlined_call_operand.vmem [shape: f32[1,512], index: 2, kind: input, shape index: {}]   ;;  %s1655_s3 = inlined_call_operand.hbm [shape: f32[512,256], index: 3, kind: input, shape index: {}]   ;;  %s1656_s4 = inlined_call_operand.vmem [shape: f32[1,256], index: 4, kind: input, shape index: {}]   ;;  %s1657_s5 = inlined_call_operand.hbm [shape: f32[2,128], index: 5, kind: output, shape index: {0}]   ;;  %s1658_s6 = inlined_call_operand.hbm [shape: f32[2,128], index: 6, kind: output, shape index: {1}]  }
   0x1   :  { %13 = vsyncpa [#allocation6], 0 }
   0x2   :  { %14 = vsyncpa [#allocation4], 0 }
   0x3   :  { %15 = vsyncpa [#allocation10], 0  ;;  %s1500_s21 = smov [#allocation5]   ;;  %s1382_s25 = scalar_lea.hbm %s1653_s1, 32768 }
   0x4   :  { %s31_s22 = sshll.u32 %s1500_s21, 4  ;;  %p1383_p0 = scmp.ne.s32.totalorder %s1653_s1, %s1382_s25  ;;  %s32_s22 = int_to_ptr.vmem [resolvable:$true] %s31_s22 }
   0x5   :  { %p1386_p1 = scmp.lt.u32.totalorder %s1382_s25, %s1653_s1 }
   0x7   :  { %p1388_p2 = pnand %p1386_p1, %p1383_p0 }
   0x9   :  { %1391 = shalt.err (!%p1388_p2)
}
   0xa   :  { %s1392_s30 = scalar_lea.vmem %s32_s22, 32768  ;;  %p1397_p4 = scmp.lt.s32.totalorder %s32_s22, %s32_s22 }
   0xb   :  { %p1393_p3 = scmp.ne.s32.totalorder %s32_s22, %s1392_s30  ;;  %p1398_p5 = scmp.lt.s32.totalorder %s1392_s30, %s1392_s30 }
   0xd   :  { %p1399_p6 = por %p1398_p5, %p1397_p4 }
   0xf   :  { %p1400_p7 = pnand %p1399_p6, %p1393_p3 }
  0x11   :  { %1403 = shalt.err (!%p1400_p7)
}
  0x12   :  { %s1501_s7 = smov 512   ;;  %s1502_s8 = smov 32  }
  0x13   :  { %37 = dma.hbm_to_vmem [thread:$0]  %s1653_s1, 32768, %s32_s22, [#allocation6], %s1501_s7, %s1501_s7, %s1502_s8  }
  0x14   :  { %s1503_s11 = smov [#allocation2]   ;;  %s1504_s13 = smov [#allocation7]  }
  0x15   :  { %s22_s12 = sshll.u32 %s1503_s11, 4  ;;  %s45_s14 = sshll.u32 %s1504_s13, 4  ;;  %s23_s12 = int_to_ptr.vmem [resolvable:$true] %s22_s12  ;;  %s46_s14 = int_to_ptr.vmem [resolvable:$true] %s45_s14 }
  0x16   :  { %s1404_s17 = scalar_lea.hbm %s1652_s0, 128 }
  0x17   :  { %p1405_p8 = scmp.ne.s32.totalorder %s1652_s0, %s1404_s17  ;;  %p1408_p9 = scmp.lt.u32.totalorder %s1404_s17, %s1652_s0 }
  0x19   :  { %p1410_p10 = pnand %p1408_p9, %p1405_p8 }
  0x1b   :  { %1413 = shalt.err (!%p1410_p10)
}
  0x1c   :  { %s1414_s1 = scalar_lea.vmem %s23_s12, 128  ;;  %p1419_p12 = scmp.lt.s32.totalorder %s23_s12, %s23_s12 }
  0x1d   :  { %p1415_p11 = scmp.ne.s32.totalorder %s23_s12, %s1414_s1  ;;  %p1420_p13 = scmp.lt.s32.totalorder %s1414_s1, %s1414_s1 }
  0x1f   :  { %p1421_p0 = por %p1420_p13, %p1419_p12 }
  0x21   :  { %p1422_p1 = pnand %p1421_p0, %p1415_p11 }
  0x23   :  { %1425 = shalt.err (!%p1422_p1)
}
  0x24   :  { %25 = dma.hbm_to_vmem [thread:$0]  %s1652_s0, 128, %s23_s12, [#allocation3]  }
  0x25   :  { %s1426_s26 = scalar_lea.hbm %s1655_s3, 16384 }
  0x26   :  { %p1427_p2 = scmp.ne.s32.totalorder %s1655_s3, %s1426_s26  ;;  %p1430_p3 = scmp.lt.u32.totalorder %s1426_s26, %s1655_s3 }
  0x28   :  { %p1432_p4 = pnand %p1430_p3, %p1427_p2 }
  0x2a   :  { %1435 = shalt.err (!%p1432_p4)
}
  0x2b   :  { %s1436_s7 = scalar_lea.vmem %s46_s14, 16384  ;;  %p1441_p6 = scmp.lt.s32.totalorder %s46_s14, %s46_s14 }
  0x2c   :  { %p1437_p5 = scmp.ne.s32.totalorder %s46_s14, %s1436_s7  ;;  %p1442_p7 = scmp.lt.s32.totalorder %s1436_s7, %s1436_s7 }
  0x2e   :  { %p1443_p8 = por %p1442_p7, %p1441_p6 }
  0x30   :  { %p1444_p9 = pnand %p1443_p8, %p1437_p5 }
  0x32   :  { %1447 = shalt.err (!%p1444_p9)
}
  0x33   :  { %s1505_s0 = smov 256   ;;  %s1506_s8 = smov 16  }
  0x34   :  { %51 = dma.hbm_to_vmem [thread:$0]  %s1655_s3, 16384, %s46_s14, [#allocation6], %s1505_s0, %s1505_s0, %s1506_s8  }
  0x35   :  { %1492 = dma.done.wait [#allocation3], 128  }
  0x36   :  { %1493 = vsyncadd [#allocation3], 4294967168 }
  0x37   :  { %1494 = dma.done.wait [#allocation6], 49152  }
  0x38   :  { %1495 = vsyncadd [#allocation6], 4294918144  ;;  %v65_v0 = vld [vmem:[#allocation5 + $0x8] sm:$0xff]  ;;  %v64_v2 = vld [vmem:[#allocation5] sm:$0xff]  ;;  %s1508_s13 = smov [#allocation8]   ;;  %s1509_s15 = smov [#allocation9]  }
  0x39   :  { %v69_v1 = vld [vmem:[#allocation5 + $0x28] sm:$0xff]  ;;  %v68_v4 = vld [vmem:[#allocation5 + $0x20] sm:$0xff]  ;;  %s951_s14 = sshll.u32 %s1508_s13, 4  ;;  %s961_s16 = sshll.u32 %s1509_s15, 4  ;;  %s952_s14 = int_to_ptr.vmem [resolvable:$true] %s951_s14  ;;  %s962_s16 = int_to_ptr.vmem [resolvable:$true] %s961_s16 }
  0x3a   :  { %v975_v3 = vpack.c.bf16 %v69_v1, %v65_v0  ;;  %v193_v5 = vld [vmem:[#allocation5 + $0x408] sm:$0xff]  ;;  %v977_v7 = vpack.c.bf16 %v68_v4, %v64_v2  ;;  %v192_v9 = vld [vmem:[#allocation5 + $0x400] sm:$0xff]  ;;  %s1448_s17 = scalar_lea.vmem %s952_s14, 32  ;;  %p1453_p11 = scmp.lt.s32.totalorder %s952_s14, %s952_s14 }
  0x3b   :  { %v197_v6 = vld [vmem:[#allocation5 + $0x428] sm:$0xff]  ;;  %v196_v10 = vld [vmem:[#allocation5 + $0x420] sm:$0xff]  ;;  %p1449_p10 = scmp.ne.s32.totalorder %s952_s14, %s1448_s17  ;;  %p1454_p12 = scmp.lt.s32.totalorder %s1448_s17, %s1448_s17 }
  0x3c   :  { %v1039_v8 = vpack.c.bf16 %v197_v6, %v193_v5  ;;  %v73_v11 = vld [vmem:[#allocation5 + $0x48] sm:$0xff]  ;;  %976 = vmatprep.subr.bf16.mxu1 %v975_v3  ;;  %v1041_v12 = vpack.c.bf16 %v196_v10, %v192_v9  ;;  %v72_v14 = vld [vmem:[#allocation5 + $0x40] sm:$0xff] }
  0x3d   :  { %v77_v13 = vld [vmem:[#allocation5 + $0x68] sm:$0xff]  ;;  %v76_v15 = vld [vmem:[#allocation5 + $0x60] sm:$0xff]  ;;  %978 = vmatpush1.bf16.msra.mxu1 %v977_v7  ;;  %p1455_p13 = por %p1454_p12, %p1453_p11 }
  0x3e   :  { %1040 = vmatprep.subr.bf16.mxu0 %v1039_v8  ;;  %v979_v16 = vpack.c.bf16 %v77_v13, %v73_v11  ;;  %v981_v17 = vpack.c.bf16 %v76_v15, %v72_v14  ;;  %v201_v18 = vld [vmem:[#allocation5 + $0x448] sm:$0xff]  ;;  %v200_v20 = vld [vmem:[#allocation5 + $0x440] sm:$0xff] }
  0x3f   :  { %v205_v19 = vld [vmem:[#allocation5 + $0x468] sm:$0xff]  ;;  %1042 = vmatpush1.bf16.msra.mxu0 %v1041_v12  ;;  %v204_v22 = vld [vmem:[#allocation5 + $0x460] sm:$0xff]  ;;  %p1456_p0 = pnand %p1455_p13, %p1449_p10 }
  0x40   :  { %v1043_v21 = vpack.c.bf16 %v205_v19, %v201_v18  ;;  %v81_v23 = vld [vmem:[#allocation5 + $0x88] sm:$0xff]  ;;  %980 = vmatprep.subr.bf16.mxu1 %v979_v16  ;;  %v1045_v25 = vpack.c.bf16 %v204_v22, %v200_v20  ;;  %v80_v27 = vld [vmem:[#allocation5 + $0x80] sm:$0xff] }
  0x41   :  { %v85_v24 = vld [vmem:[#allocation5 + $0xa8] sm:$0xff]  ;;  %v84_v28 = vld [vmem:[#allocation5 + $0xa0] sm:$0xff]  ;;  %982 = vmatpush1.bf16.msra.mxu1 %v981_v17 }
  0x42   :  { %v983_v26 = vpack.c.bf16 %v85_v24, %v81_v23  ;;  %v209_v29 = vld [vmem:[#allocation5 + $0x488] sm:$0xff]  ;;  %1044 = vmatprep.subr.bf16.mxu0 %v1043_v21  ;;  %v208_v31 = vld [vmem:[#allocation5 + $0x480] sm:$0xff]  ;;  %v985_v33 = vpack.c.bf16 %v84_v28, %v80_v27 }
  0x43   :  { %v213_v30 = vld [vmem:[#allocation5 + $0x4a8] sm:$0xff]  ;;  %v212_v32 = vld [vmem:[#allocation5 + $0x4a0] sm:$0xff]  ;;  %1046 = vmatpush1.bf16.msra.mxu0 %v1045_v25 }
  0x44   :  { %v1047_v34 = vpack.c.bf16 %v213_v30, %v209_v29  ;;  %v89_v35 = vld [vmem:[#allocation5 + $0xc8] sm:$0xff]  ;;  %v88_v37 = vld [vmem:[#allocation5 + $0xc0] sm:$0xff]  ;;  %984 = vmatprep.subr.bf16.mxu1 %v983_v26  ;;  %v1049_v38 = vpack.c.bf16 %v212_v32, %v208_v31 }
  0x45   :  { %v93_v36 = vld [vmem:[#allocation5 + $0xe8] sm:$0xff]  ;;  %v92_v40 = vld [vmem:[#allocation5 + $0xe0] sm:$0xff]  ;;  %986 = vmatpush1.bf16.msra.mxu1 %v985_v33 }
  0x46   :  { %v987_v39 = vpack.c.bf16 %v93_v36, %v89_v35  ;;  %v217_v41 = vld [vmem:[#allocation5 + $0x4c8] sm:$0xff]  ;;  %1048 = vmatprep.subr.bf16.mxu0 %v1047_v34  ;;  %v216_v44 = vld [vmem:[#allocation5 + $0x4c0] sm:$0xff]  ;;  %v989_v48 = vpack.c.bf16 %v92_v40, %v88_v37 }
  0x47   :  { %v221_v42 = vld [vmem:[#allocation5 + $0x4e8] sm:$0xff]  ;;  %v220_v45 = vld [vmem:[#allocation5 + $0x4e0] sm:$0xff]  ;;  %1050 = vmatpush1.bf16.msra.mxu0 %v1049_v38 }
  0x48   :  { %v1051_v43 = vpack.c.bf16 %v221_v42, %v217_v41  ;;  %v97_v46 = vld [vmem:[#allocation5 + $0x108] sm:$0xff]  ;;  %988 = vmatprep.subr.bf16.mxu1 %v987_v39  ;;  %v1053_v51 = vpack.c.bf16 %v220_v45, %v216_v44  ;;  %v96_v53 = vld [vmem:[#allocation5 + $0x100] sm:$0xff] }
  0x49   :  { %v101_v47 = vld [vmem:[#allocation5 + $0x128] sm:$0xff]  ;;  %v100_v54 = vld [vmem:[#allocation5 + $0x120] sm:$0xff]  ;;  %990 = vmatpush1.bf16.msra.mxu1 %v989_v48 }
  0x4a   :  { %v225_v49 = vld [vmem:[#allocation5 + $0x508] sm:$0xff]  ;;  %v991_v52 = vpack.c.bf16 %v101_v47, %v97_v46  ;;  %v224_v55 = vld [vmem:[#allocation5 + $0x500] sm:$0xff]  ;;  %1052 = vmatprep.subr.bf16.mxu0 %v1051_v43  ;;  %v993_v62 = vpack.c.bf16 %v100_v54, %v96_v53  ;;  %v322_v46 = vlaneseq  ;;  %v1507_v47 = vmov 1983009808  }
  0x4b   :  { %v229_v50 = vld [vmem:[#allocation5 + $0x528] sm:$0xff]  ;;  %v228_v57 = vld [vmem:[#allocation5 + $0x520] sm:$0xff]  ;;  %1054 = vmatpush1.bf16.msra.mxu0 %v1053_v51  ;;  %v345_v48 = vunpack.c.l.s4 %v1507_v47 }
  0x4c   :  { %v1055_v56 = vpack.c.bf16 %v229_v50, %v225_v49  ;;  %v105_v58 = vld [vmem:[#allocation5 + $0x148] sm:$0xff]  ;;  %992 = vmatprep.subr.bf16.mxu1 %v991_v52  ;;  %v1057_v63 = vpack.c.bf16 %v228_v57, %v224_v55  ;;  %v104_v1 = vld [vmem:[#allocation5 + $0x140] sm:$0xff] }
  0x4d   :  { %v109_v59 = vld [vmem:[#allocation5 + $0x168] sm:$0xff]  ;;  %v108_v2 = vld [vmem:[#allocation5 + $0x160] sm:$0xff]  ;;  %994 = vmatpush1.bf16.msra.mxu1 %v993_v62  ;;  %v346_v62 = vunpack.c.0.s8 %v345_v48 }
  0x4e   :  { %v233_v60 = vld [vmem:[#allocation5 + $0x548] sm:$0xff]  ;;  %v995_v0 = vpack.c.bf16 %v109_v59, %v105_v58  ;;  %v232_v3 = vld [vmem:[#allocation5 + $0x540] sm:$0xff]  ;;  %1056 = vmatprep.subr.bf16.mxu0 %v1055_v56  ;;  %v997_v10 = vpack.c.bf16 %v108_v2, %v104_v1 }
  0x4f   :  { %v237_v61 = vld [vmem:[#allocation5 + $0x568] sm:$0xff]  ;;  %v236_v5 = vld [vmem:[#allocation5 + $0x560] sm:$0xff]  ;;  %1058 = vmatpush1.bf16.msra.mxu0 %v1057_v63 }
  0x50   :  { %v1059_v4 = vpack.c.bf16 %v237_v61, %v233_v60  ;;  %v113_v6 = vld [vmem:[#allocation5 + $0x188] sm:$0xff]  ;;  %996 = vmatprep.subr.bf16.mxu1 %v995_v0  ;;  %v1061_v11 = vpack.c.bf16 %v236_v5, %v232_v3  ;;  %v112_v13 = vld [vmem:[#allocation5 + $0x180] sm:$0xff]  ;;  %v1581_v61 = vshrl.u32 %v322_v46, 7 }
  0x51   :  { %v117_v7 = vld [vmem:[#allocation5 + $0x1a8] sm:$0xff]  ;;  %v116_v14 = vld [vmem:[#allocation5 + $0x1a0] sm:$0xff]  ;;  %998 = vmatpush1.bf16.msra.mxu1 %v997_v10 }
  0x52   :  { %v241_v8 = vld [vmem:[#allocation5 + $0x588] sm:$0xff]  ;;  %v999_v12 = vpack.c.bf16 %v117_v7, %v113_v6  ;;  %v240_v15 = vld [vmem:[#allocation5 + $0x580] sm:$0xff]  ;;  %1060 = vmatprep.subr.bf16.mxu0 %v1059_v4  ;;  %v1001_v22 = vpack.c.bf16 %v116_v14, %v112_v13 }
  0x53   :  { %v245_v9 = vld [vmem:[#allocation5 + $0x5a8] sm:$0xff]  ;;  %v244_v17 = vld [vmem:[#allocation5 + $0x5a0] sm:$0xff]  ;;  %1062 = vmatpush1.bf16.msra.mxu0 %v1061_v11  ;;  %v349_v11 = vsub.s32 %v346_v62, %v1581_v61 }
  0x54   :  { %v1063_v16 = vpack.c.bf16 %v245_v9, %v241_v8  ;;  %v121_v18 = vld [vmem:[#allocation5 + $0x1c8] sm:$0xff]  ;;  %1000 = vmatprep.subr.bf16.mxu1 %v999_v12  ;;  %v1065_v23 = vpack.c.bf16 %v244_v17, %v240_v15  ;;  %v120_v25 = vld [vmem:[#allocation5 + $0x1c0] sm:$0xff] }
  0x55   :  { %v125_v19 = vld [vmem:[#allocation5 + $0x1e8] sm:$0xff]  ;;  %v124_v26 = vld [vmem:[#allocation5 + $0x1e0] sm:$0xff]  ;;  %1002 = vmatpush1.bf16.msra.mxu1 %v1001_v22  ;;  %v63_v22 = vld [vmem:[#allocation2] sm:$0xff] }
  0x56   :  { %v249_v20 = vld [vmem:[#allocation5 + $0x5c8] sm:$0xff]  ;;  %v1003_v24 = vpack.c.bf16 %v125_v19, %v121_v18  ;;  %v248_v27 = vld [vmem:[#allocation5 + $0x5c0] sm:$0xff]  ;;  %1064 = vmatprep.subr.bf16.mxu0 %v1063_v16  ;;  %v1005_v34 = vpack.c.bf16 %v124_v26, %v120_v25  ;;  %v1584_v25 = vrot.slane %v63_v22, %v349_v11  ;;  %v343_v26 = vcombine.high %v63_v22, %v63_v22  ;;  %v74_v22 = vld [vmem:[#allocation5 + $0x50] sm:$0xff] }
  0x57   :  { %v253_v21 = vld [vmem:[#allocation5 + $0x5e8] sm:$0xff]  ;;  %v252_v29 = vld [vmem:[#allocation5 + $0x5e0] sm:$0xff]  ;;  %1066 = vmatpush1.bf16.msra.mxu0 %v1065_v23 }
  0x58   :  { %v1067_v28 = vpack.c.bf16 %v253_v21, %v249_v20  ;;  %v129_v30 = vld [vmem:[#allocation5 + $0x208] sm:$0xff]  ;;  %1004 = vmatprep.subr.bf16.mxu1 %v1003_v24  ;;  %v1069_v35 = vpack.c.bf16 %v252_v29, %v248_v27  ;;  %v128_v37 = vld [vmem:[#allocation5 + $0x200] sm:$0xff] }
  0x59   :  { %v133_v31 = vld [vmem:[#allocation5 + $0x228] sm:$0xff]  ;;  %v132_v38 = vld [vmem:[#allocation5 + $0x220] sm:$0xff]  ;;  %1006 = vmatpush1.bf16.msra.mxu1 %v1005_v34  ;;  %v1590_v34 = vrot.slane %v343_v26, %v349_v11  ;;  %v67_v11 = vld [vmem:[#allocation5 + $0x18] sm:$0xff] }
  0x5a   :  { %v257_v32 = vld [vmem:[#allocation5 + $0x608] sm:$0xff]  ;;  %v1007_v36 = vpack.c.bf16 %v133_v31, %v129_v30  ;;  %v256_v39 = vld [vmem:[#allocation5 + $0x600] sm:$0xff]  ;;  %1068 = vmatprep.subr.bf16.mxu0 %v1067_v28  ;;  %v1009_v49 = vpack.c.bf16 %v132_v38, %v128_v37  ;;  %v87_v26 = vld [vmem:[#allocation5 + $0xb8] sm:$0xff] }
  0x5b   :  { %v261_v33 = vld [vmem:[#allocation5 + $0x628] sm:$0xff]  ;;  %v260_v41 = vld [vmem:[#allocation5 + $0x620] sm:$0xff]  ;;  %1070 = vmatpush1.bf16.msra.mxu0 %v1069_v35 }
  0x5c   :  { %v1071_v40 = vpack.c.bf16 %v261_v33, %v257_v32  ;;  %v137_v42 = vld [vmem:[#allocation5 + $0x248] sm:$0xff]  ;;  %1008 = vmatprep.subr.bf16.mxu1 %v1007_v36  ;;  %v1073_v50 = vpack.c.bf16 %v260_v41, %v256_v39  ;;  %v136_v52 = vld [vmem:[#allocation5 + $0x240] sm:$0xff]  ;;  %v1588_v33 = vcombine.high %v1584_v25, %v1584_v25  ;;  %v1595_v41 = vcombine.high %v1590_v34, %v1590_v34 }
  0x5d   :  { %v141_v43 = vld [vmem:[#allocation5 + $0x268] sm:$0xff]  ;;  %v140_v53 = vld [vmem:[#allocation5 + $0x260] sm:$0xff]  ;;  %1010 = vmatpush1.bf16.msra.mxu1 %v1009_v49 }
  0x5e   :  { %v265_v44 = vld [vmem:[#allocation5 + $0x648] sm:$0xff]  ;;  %v1011_v51 = vpack.c.bf16 %v141_v43, %v137_v42  ;;  %v264_v54 = vld [vmem:[#allocation5 + $0x640] sm:$0xff]  ;;  %1072 = vmatprep.subr.bf16.mxu0 %v1071_v40  ;;  %v1013_v63 = vpack.c.bf16 %v140_v53, %v136_v52  ;;  %428 = vmatprep.mubr.f32.mxu1 %v1588_v33 }
  0x5f   :  { %v269_v45 = vld [vmem:[#allocation5 + $0x668] sm:$0xff]  ;;  %v268_v56 = vld [vmem:[#allocation5 + $0x660] sm:$0xff]  ;;  %1074 = vmatpush1.bf16.msra.mxu0 %v1073_v50  ;;  %499 = vmatprep.mubr.f32.mxu0 %v1595_v41 }
  0x60   :  { %v1075_v55 = vpack.c.bf16 %v269_v45, %v265_v44  ;;  %v145_v57 = vld [vmem:[#allocation5 + $0x288] sm:$0xff]  ;;  %1012 = vmatprep.subr.bf16.mxu1 %v1011_v51  ;;  %v1077_v0 = vpack.c.bf16 %v268_v56, %v264_v54  ;;  %v144_v2 = vld [vmem:[#allocation5 + $0x280] sm:$0xff] }
  0x61   :  { %v149_v58 = vld [vmem:[#allocation5 + $0x2a8] sm:$0xff]  ;;  %v148_v3 = vld [vmem:[#allocation5 + $0x2a0] sm:$0xff]  ;;  %1014 = vmatpush1.bf16.msra.mxu1 %v1013_v63 }
  0x62   :  { %v273_v59 = vld [vmem:[#allocation5 + $0x688] sm:$0xff]  ;;  %v1015_v1 = vpack.c.bf16 %v149_v58, %v145_v57  ;;  %v272_v4 = vld [vmem:[#allocation5 + $0x680] sm:$0xff]  ;;  %1076 = vmatprep.subr.bf16.mxu0 %v1075_v55  ;;  %v1017_v12 = vpack.c.bf16 %v148_v3, %v144_v2 }
  0x63   :  { %v277_v60 = vld [vmem:[#allocation5 + $0x6a8] sm:$0xff]  ;;  %v276_v6 = vld [vmem:[#allocation5 + $0x6a0] sm:$0xff]  ;;  %1078 = vmatpush1.bf16.msra.mxu0 %v1077_v0 }
  0x64   :  { %v1079_v5 = vpack.c.bf16 %v277_v60, %v273_v59  ;;  %v153_v7 = vld [vmem:[#allocation5 + $0x2c8] sm:$0xff]  ;;  %v152_v13 = vld [vmem:[#allocation5 + $0x2c0] sm:$0xff]  ;;  %1016 = vmatprep.subr.bf16.mxu1 %v1015_v1  ;;  %v1081_v14 = vpack.c.bf16 %v276_v6, %v272_v4 }
  0x65   :  { %v157_v8 = vld [vmem:[#allocation5 + $0x2e8] sm:$0xff]  ;;  %v156_v16 = vld [vmem:[#allocation5 + $0x2e0] sm:$0xff]  ;;  %1018 = vmatpush1.bf16.msra.mxu1 %v1017_v12  ;;  %v71_v12 = vld [vmem:[#allocation5 + $0x38] sm:$0xff] }
  0x66   :  { %v281_v9 = vld [vmem:[#allocation5 + $0x6c8] sm:$0xff]  ;;  %v1019_v15 = vpack.c.bf16 %v157_v8, %v153_v7  ;;  %v280_v17 = vld [vmem:[#allocation5 + $0x6c0] sm:$0xff]  ;;  %1080 = vmatprep.subr.bf16.mxu0 %v1079_v5  ;;  %v1021_v27 = vpack.c.bf16 %v156_v16, %v152_v13  ;;  %v66_v16 = vld [vmem:[#allocation5 + $0x10] sm:$0xff] }
  0x67   :  { %v285_v10 = vld [vmem:[#allocation5 + $0x6e8] sm:$0xff]  ;;  %v284_v18 = vld [vmem:[#allocation5 + $0x6e0] sm:$0xff]  ;;  %1082 = vmatpush1.bf16.msra.mxu0 %v1081_v14 }
  0x68   :  { %v1083_v19 = vpack.c.bf16 %v285_v10, %v281_v9  ;;  %v161_v20 = vld [vmem:[#allocation5 + $0x308] sm:$0xff]  ;;  %v1085_v28 = vpack.c.bf16 %v284_v18, %v280_v17  ;;  %1020 = vmatprep.subr.bf16.mxu1 %v1019_v15  ;;  %v160_v30 = vld [vmem:[#allocation5 + $0x300] sm:$0xff]  ;;  %v1103_v15 = vpack.c.bf16 %v71_v12, %v67_v11  ;;  %v70_v17 = vld [vmem:[#allocation5 + $0x30] sm:$0xff] }
  0x69   :  { %v165_v21 = vld [vmem:[#allocation5 + $0x328] sm:$0xff]  ;;  %v164_v31 = vld [vmem:[#allocation5 + $0x320] sm:$0xff]  ;;  %1022 = vmatpush1.bf16.msra.mxu1 %v1021_v27  ;;  %v75_v18 = vld [vmem:[#allocation5 + $0x58] sm:$0xff] }
  0x6a   :  { %v289_v23 = vld [vmem:[#allocation5 + $0x708] sm:$0xff]  ;;  %v1023_v29 = vpack.c.bf16 %v165_v21, %v161_v20  ;;  %v288_v32 = vld [vmem:[#allocation5 + $0x700] sm:$0xff]  ;;  %1084 = vmatprep.subr.bf16.mxu0 %v1083_v19  ;;  %v1025_v42 = vpack.c.bf16 %v164_v31, %v160_v30  ;;  %v79_v19 = vld [vmem:[#allocation5 + $0x78] sm:$0xff]  ;;  %v1105_v20 = vpack.c.bf16 %v70_v17, %v66_v16 }
  0x6b   :  { %v293_v24 = vld [vmem:[#allocation5 + $0x728] sm:$0xff]  ;;  %v292_v36 = vld [vmem:[#allocation5 + $0x720] sm:$0xff]  ;;  %1086 = vmatpush1.bf16.msra.mxu0 %v1085_v28  ;;  %v1107_v21 = vpack.c.bf16 %v79_v19, %v75_v18  ;;  %v86_v30 = vld [vmem:[#allocation5 + $0xb0] sm:$0xff] }
  0x6c   :  { %v1087_v35 = vpack.c.bf16 %v293_v24, %v289_v23  ;;  %v169_v37 = vld [vmem:[#allocation5 + $0x348] sm:$0xff]  ;;  %1024 = vmatprep.subr.bf16.mxu1 %v1023_v29  ;;  %v1089_v43 = vpack.c.bf16 %v292_v36, %v288_v32  ;;  %v168_v45 = vld [vmem:[#allocation5 + $0x340] sm:$0xff]  ;;  %v78_v23 = vld [vmem:[#allocation5 + $0x70] sm:$0xff] }
  0x6d   :  { %v173_v38 = vld [vmem:[#allocation5 + $0x368] sm:$0xff]  ;;  %v172_v46 = vld [vmem:[#allocation5 + $0x360] sm:$0xff]  ;;  %1026 = vmatpush1.bf16.msra.mxu1 %v1025_v42  ;;  %v83_v24 = vld [vmem:[#allocation5 + $0x98] sm:$0xff]  ;;  %v1109_v27 = vpack.c.bf16 %v78_v23, %v74_v22 }
  0x6e   :  { %v297_v39 = vld [vmem:[#allocation5 + $0x748] sm:$0xff]  ;;  %v1027_v44 = vpack.c.bf16 %v173_v38, %v169_v37  ;;  %v296_v47 = vld [vmem:[#allocation5 + $0x740] sm:$0xff]  ;;  %1088 = vmatprep.subr.bf16.mxu0 %v1087_v35  ;;  %v1029_v54 = vpack.c.bf16 %v172_v46, %v168_v45  ;;  %v1111_v28 = vpack.c.bf16 %v87_v26, %v83_v24  ;;  %v82_v29 = vld [vmem:[#allocation5 + $0x90] sm:$0xff] }
  0x6f   :  { %v301_v40 = vld [vmem:[#allocation5 + $0x768] sm:$0xff]  ;;  %v300_v49 = vld [vmem:[#allocation5 + $0x760] sm:$0xff]  ;;  %1090 = vmatpush1.bf16.msra.mxu0 %v1089_v43  ;;  %v91_v31 = vld [vmem:[#allocation5 + $0xd8] sm:$0xff]  ;;  %v1113_v35 = vpack.c.bf16 %v86_v30, %v82_v29 }
  0x70   :  { %v1091_v48 = vpack.c.bf16 %v301_v40, %v297_v39  ;;  %v177_v50 = vld [vmem:[#allocation5 + $0x388] sm:$0xff]  ;;  %1028 = vmatprep.subr.bf16.mxu1 %v1027_v44  ;;  %v1093_v55 = vpack.c.bf16 %v300_v49, %v296_v47  ;;  %v176_v57 = vld [vmem:[#allocation5 + $0x380] sm:$0xff]  ;;  %v95_v32 = vld [vmem:[#allocation5 + $0xf8] sm:$0xff] }
  0x71   :  { %v181_v51 = vld [vmem:[#allocation5 + $0x3a8] sm:$0xff]  ;;  %v180_v58 = vld [vmem:[#allocation5 + $0x3a0] sm:$0xff]  ;;  %1030 = vmatpush1.bf16.msra.mxu1 %v1029_v54  ;;  %v1115_v36 = vpack.c.bf16 %v95_v32, %v91_v31  ;;  %v90_v37 = vld [vmem:[#allocation5 + $0xd0] sm:$0xff] }
  0x72   :  { %v305_v52 = vld [vmem:[#allocation5 + $0x788] sm:$0xff]  ;;  %v1031_v56 = vpack.c.bf16 %v181_v51, %v177_v50  ;;  %v304_v59 = vld [vmem:[#allocation5 + $0x780] sm:$0xff]  ;;  %1092 = vmatprep.subr.bf16.mxu0 %v1091_v48  ;;  %v1033_v3 = vpack.c.bf16 %v180_v58, %v176_v57  ;;  %v94_v38 = vld [vmem:[#allocation5 + $0xf0] sm:$0xff] }
  0x73   :  { %v309_v53 = vld [vmem:[#allocation5 + $0x7a8] sm:$0xff]  ;;  %v308_v62 = vld [vmem:[#allocation5 + $0x7a0] sm:$0xff]  ;;  %1094 = vmatpush1.bf16.msra.mxu0 %v1093_v55  ;;  %v99_v39 = vld [vmem:[#allocation5 + $0x118] sm:$0xff]  ;;  %v1117_v42 = vpack.c.bf16 %v94_v38, %v90_v37 }
  0x74   :  { %v1095_v60 = vpack.c.bf16 %v309_v53, %v305_v52  ;;  %v185_v63 = vld [vmem:[#allocation5 + $0x3c8] sm:$0xff]  ;;  %1032 = vmatprep.subr.bf16.mxu1 %v1031_v56  ;;  %v1097_v4 = vpack.c.bf16 %v308_v62, %v304_v59  ;;  %v184_v6 = vld [vmem:[#allocation5 + $0x3c0] sm:$0xff]  ;;  %v103_v40 = vld [vmem:[#allocation5 + $0x138] sm:$0xff] }
  0x75   :  { %v189_v0 = vld [vmem:[#allocation5 + $0x3e8] sm:$0xff]  ;;  %v188_v7 = vld [vmem:[#allocation5 + $0x3e0] sm:$0xff]  ;;  %1034 = vmatpush1.bf16.msra.mxu1 %v1033_v3  ;;  %v1119_v43 = vpack.c.bf16 %v103_v40, %v99_v39  ;;  %v98_v44 = vld [vmem:[#allocation5 + $0x110] sm:$0xff] }
  0x76   :  { %v313_v1 = vld [vmem:[#allocation5 + $0x7c8] sm:$0xff]  ;;  %v1035_v5 = vpack.c.bf16 %v189_v0, %v185_v63  ;;  %v312_v8 = vld [vmem:[#allocation5 + $0x7c0] sm:$0xff]  ;;  %1096 = vmatprep.subr.bf16.mxu0 %v1095_v60  ;;  %v1037_v13 = vpack.c.bf16 %v188_v7, %v184_v6  ;;  %v102_v45 = vld [vmem:[#allocation5 + $0x130] sm:$0xff] }
  0x77   :  { %v317_v2 = vld [vmem:[#allocation5 + $0x7e8] sm:$0xff]  ;;  %v316_v10 = vld [vmem:[#allocation5 + $0x7e0] sm:$0xff]  ;;  %1098 = vmatpush1.bf16.msra.mxu0 %v1097_v4  ;;  %v107_v46 = vld [vmem:[#allocation5 + $0x158] sm:$0xff] }
  0x78   :  { %v1099_v9 = vpack.c.bf16 %v317_v2, %v313_v1  ;;  %1036 = vmatprep.subr.bf16.mxu1 %v1035_v5  ;;  %v1101_v14 = vpack.c.bf16 %v316_v10, %v312_v8  ;;  %v111_v47 = vld [vmem:[#allocation5 + $0x178] sm:$0xff]  ;;  %v106_v49 = vld [vmem:[#allocation5 + $0x150] sm:$0xff]  ;;  %v661_v59 = vld [vmem:[#allocation7 + $0x8] sm:$0xff] }
  0x79   :  { %1038 = vmatpush1.bf16.msra.mxu1 %v1037_v13  ;;  %v1123_v48 = vpack.c.bf16 %v111_v47, %v107_v46  ;;  %v110_v50 = vld [vmem:[#allocation5 + $0x170] sm:$0xff]  ;;  %v115_v51 = vld [vmem:[#allocation5 + $0x198] sm:$0xff]  ;;  %v660_v62 = vld [vmem:[#allocation7] sm:$0xff] }
  0x7a   :  { %1100 = vmatprep.subr.bf16.mxu0 %v1099_v9  ;;  %1104 = vmatprep.subr.bf16.mxu1 %v1103_v15  ;;  %v119_v52 = vld [vmem:[#allocation5 + $0x1b8] sm:$0xff]  ;;  %v1125_v53 = vpack.c.bf16 %v110_v50, %v106_v49  ;;  %v114_v54 = vld [vmem:[#allocation5 + $0x190] sm:$0xff]  ;;  %v665_v2 = vld [vmem:[#allocation7 + $0x28] sm:$0xff] }
  0x7b   :  { %1102 = vmatpush1.bf16.msra.mxu0 %v1101_v14  ;;  %v118_v55 = vld [vmem:[#allocation5 + $0x1b0] sm:$0xff]  ;;  %v1127_v56 = vpack.c.bf16 %v119_v52, %v115_v51  ;;  %v123_v57 = vld [vmem:[#allocation5 + $0x1d8] sm:$0xff]  ;;  %v664_v4 = vld [vmem:[#allocation7 + $0x20] sm:$0xff] }
  0x7c   :  { %429 = vmatmul.mubr.f32.vlgmr.msra.gmra.mrb[0].mxu1 %v1584_v25  ;;  %v127_v58 = vld [vmem:[#allocation5 + $0x1f8] sm:$0xff]  ;;  %v662_v63 = vld [vmem:[#allocation7 + $0x10] sm:$0xff]  ;;  %v1129_v5 = vpack.c.bf16 %v118_v55, %v114_v54  ;;  %v669_v8 = vld [vmem:[#allocation7 + $0x48] sm:$0xff] }
  0x7d   :  { %1106 = vmatpush1.bf16.msra.mxu1 %v1105_v20  ;;  %570 = vmatprep.mubr.f32.mxu1 %v1588_v33  ;;  %v1121_v33 = vpack.c.bf16 %v102_v45, %v98_v44  ;;  %v663_v60 = vld [vmem:[#allocation7 + $0x18] sm:$0xff]  ;;  %v1233_v1 = vpack.c.bf16 %v662_v63, %v660_v62  ;;  %v666_v7 = vld [vmem:[#allocation7 + $0x30] sm:$0xff]  ;;  %v1131_v10 = vpack.c.bf16 %v127_v58, %v123_v57  ;;  %v668_v17 = vld [vmem:[#allocation7 + $0x40] sm:$0xff] }
  0x7e   :  { %500 = vmatmul.mubr.f32.vlgmr.msra.gmra.mrb[0].mxu0 %v1590_v34  ;;  %1108 = vmatprep.subr.bf16.mxu1 %v1107_v21  ;;  %v1231_v0 = vpack.c.bf16 %v663_v60, %v661_v59  ;;  %v667_v3 = vld [vmem:[#allocation7 + $0x38] sm:$0xff]  ;;  %v122_v11 = vld [vmem:[#allocation5 + $0x1d0] sm:$0xff]  ;;  %v1237_v15 = vpack.c.bf16 %v666_v7, %v664_v4  ;;  %v673_v20 = vld [vmem:[#allocation7 + $0x68] sm:$0xff] }
  0x7f   :  { %v1235_v6 = vpack.c.bf16 %v667_v3, %v665_v2  ;;  %v671_v9 = vld [vmem:[#allocation7 + $0x58] sm:$0xff]  ;;  %v126_v12 = vld [vmem:[#allocation5 + $0x1f0] sm:$0xff]  ;;  %v672_v30 = vld [vmem:[#allocation7 + $0x60] sm:$0xff] }
  0x80   :  { %1232 = vmatprep.subr.bf16.mxu0 %v1231_v0  ;;  %v131_v13 = vld [vmem:[#allocation5 + $0x218] sm:$0xff]  ;;  %v1239_v16 = vpack.c.bf16 %v671_v9, %v669_v8  ;;  %v670_v18 = vld [vmem:[#allocation7 + $0x50] sm:$0xff]  ;;  %v1133_v19 = vpack.c.bf16 %v126_v12, %v122_v11  ;;  %v676_v45 = vld [vmem:[#allocation7 + $0x80] sm:$0xff] }
  0x81   :  { %1110 = vmatpush1.bf16.msra.mxu1 %v1109_v27  ;;  %v135_v14 = vld [vmem:[#allocation5 + $0x238] sm:$0xff]  ;;  %1234 = vmatpush1.bf16.msra.mxu0 %v1233_v1  ;;  %v130_v23 = vld [vmem:[#allocation5 + $0x210] sm:$0xff]  ;;  %v685_v59 = vld [vmem:[#allocation7 + $0xc8] sm:$0xff] }
  0x82   :  { %1112 = vmatprep.subr.bf16.mxu1 %v1111_v28  ;;  %1236 = vmatprep.subr.bf16.mxu0 %v1235_v6  ;;  %v675_v21 = vld [vmem:[#allocation7 + $0x78] sm:$0xff]  ;;  %v1135_v22 = vpack.c.bf16 %v135_v14, %v131_v13  ;;  %v134_v24 = vld [vmem:[#allocation5 + $0x230] sm:$0xff]  ;;  %v1241_v28 = vpack.c.bf16 %v670_v18, %v668_v17  ;;  %v689_v8 = vld [vmem:[#allocation7 + $0xe8] sm:$0xff] }
  0x83   :  { %v139_v26 = vld [vmem:[#allocation5 + $0x258] sm:$0xff]  ;;  %v1243_v29 = vpack.c.bf16 %v675_v21, %v673_v20  ;;  %v674_v31 = vld [vmem:[#allocation7 + $0x70] sm:$0xff]  ;;  %v1137_v32 = vpack.c.bf16 %v134_v24, %v130_v23  ;;  %v688_v17 = vld [vmem:[#allocation7 + $0xe0] sm:$0xff] }
  0x84   :  { %v143_v27 = vld [vmem:[#allocation5 + $0x278] sm:$0xff]  ;;  %v138_v38 = vld [vmem:[#allocation5 + $0x250] sm:$0xff]  ;;  %v693_v20 = vld [vmem:[#allocation7 + $0x108] sm:$0xff] }
  0x85   :  { %1114 = vmatpush1.bf16.msra.mxu1 %v1113_v35  ;;  %1238 = vmatpush1.bf16.msra.mxu0 %v1237_v15  ;;  %v677_v35 = vld [vmem:[#allocation7 + $0x88] sm:$0xff]  ;;  %v1139_v37 = vpack.c.bf16 %v143_v27, %v139_v26  ;;  %v142_v39 = vld [vmem:[#allocation5 + $0x270] sm:$0xff]  ;;  %v147_v40 = vld [vmem:[#allocation5 + $0x298] sm:$0xff] }
  0x86   :  { %1116 = vmatprep.subr.bf16.mxu1 %v1115_v36  ;;  %1240 = vmatprep.subr.bf16.mxu0 %v1239_v16  ;;  %v679_v36 = vld [vmem:[#allocation7 + $0x98] sm:$0xff]  ;;  %v678_v46 = vld [vmem:[#allocation7 + $0x90] sm:$0xff]  ;;  %v1141_v47 = vpack.c.bf16 %v142_v39, %v138_v38 }
  0x87   :  { %v1247_v44 = vpack.c.bf16 %v679_v36, %v677_v35  ;;  %v146_v50 = vld [vmem:[#allocation5 + $0x290] sm:$0xff]  ;;  %v155_v52 = vld [vmem:[#allocation5 + $0x2d8] sm:$0xff]  ;;  %v1249_v54 = vpack.c.bf16 %v678_v46, %v676_v45  ;;  %v697_v35 = vld [vmem:[#allocation7 + $0x128] sm:$0xff] }
  0x88   :  { %v150_v51 = vld [vmem:[#allocation5 + $0x2b0] sm:$0xff]  ;;  %v687_v60 = vld [vmem:[#allocation7 + $0xd8] sm:$0xff]  ;;  %v696_v45 = vld [vmem:[#allocation7 + $0x120] sm:$0xff] }
  0x89   :  { %1118 = vmatpush1.bf16.msra.mxu1 %v1117_v42  ;;  %v151_v42 = vld [vmem:[#allocation5 + $0x2b8] sm:$0xff]  ;;  %1242 = vmatpush1.bf16.msra.mxu0 %v1241_v28  ;;  %v682_v57 = vld [vmem:[#allocation7 + $0xb0] sm:$0xff]  ;;  %v1145_v58 = vpack.c.bf16 %v150_v51, %v146_v50  ;;  %v1255_v4 = vpack.c.bf16 %v687_v60, %v685_v59  ;;  %v705_v59 = vld [vmem:[#allocation7 + $0x168] sm:$0xff] }
  0x8a   :  { %1120 = vmatprep.subr.bf16.mxu1 %v1119_v43  ;;  %v1245_v43 = vpack.c.bf16 %v674_v31, %v672_v30  ;;  %1244 = vmatprep.subr.bf16.mxu0 %v1243_v29  ;;  %v1143_v49 = vpack.c.bf16 %v151_v42, %v147_v40  ;;  %v154_v63 = vld [vmem:[#allocation5 + $0x2d0] sm:$0xff]  ;;  %v163_v1 = vld [vmem:[#allocation5 + $0x318] sm:$0xff]  ;;  %v692_v30 = vld [vmem:[#allocation7 + $0x100] sm:$0xff] }
  0x8b   :  { %v158_v0 = vld [vmem:[#allocation5 + $0x2f0] sm:$0xff]  ;;  %v167_v2 = vld [vmem:[#allocation5 + $0x338] sm:$0xff] }
  0x8c   :  { %v686_v6 = vld [vmem:[#allocation7 + $0xd0] sm:$0xff]  ;;  %v1149_v7 = vpack.c.bf16 %v158_v0, %v154_v63  ;;  %v691_v9 = vld [vmem:[#allocation7 + $0xf8] sm:$0xff] }
  0x8d   :  { %1122 = vmatpush1.bf16.msra.mxu1 %v1121_v33  ;;  %v681_v33 = vld [vmem:[#allocation7 + $0xa8] sm:$0xff]  ;;  %1246 = vmatpush1.bf16.msra.mxu0 %v1245_v43  ;;  %v162_v11 = vld [vmem:[#allocation5 + $0x310] sm:$0xff]  ;;  %v171_v13 = vld [vmem:[#allocation5 + $0x358] sm:$0xff]  ;;  %v1259_v16 = vpack.c.bf16 %v691_v9, %v689_v8 }
  0x8e   :  { %1124 = vmatprep.subr.bf16.mxu1 %v1123_v48  ;;  %v683_v48 = vld [vmem:[#allocation7 + $0xb8] sm:$0xff]  ;;  %1248 = vmatprep.subr.bf16.mxu0 %v1247_v44  ;;  %v166_v12 = vld [vmem:[#allocation5 + $0x330] sm:$0xff]  ;;  %v709_v8 = vld [vmem:[#allocation7 + $0x188] sm:$0xff] }
  0x8f   :  { %v1251_v55 = vpack.c.bf16 %v683_v48, %v681_v33  ;;  %v175_v14 = vld [vmem:[#allocation5 + $0x378] sm:$0xff]  ;;  %v690_v18 = vld [vmem:[#allocation7 + $0xf0] sm:$0xff]  ;;  %v701_v33 = vld [vmem:[#allocation7 + $0x148] sm:$0xff] }
  0x90   :  { %v695_v21 = vld [vmem:[#allocation7 + $0x118] sm:$0xff]  ;;  %v170_v23 = vld [vmem:[#allocation5 + $0x350] sm:$0xff]  ;;  %v1261_v28 = vpack.c.bf16 %v690_v18, %v688_v17  ;;  %v708_v17 = vld [vmem:[#allocation7 + $0x180] sm:$0xff] }
  0x91   :  { %1126 = vmatpush1.bf16.msra.mxu1 %v1125_v53  ;;  %v159_v53 = vld [vmem:[#allocation5 + $0x2f8] sm:$0xff]  ;;  %1250 = vmatpush1.bf16.msra.mxu0 %v1249_v54  ;;  %v174_v24 = vld [vmem:[#allocation5 + $0x370] sm:$0xff]  ;;  %v1263_v29 = vpack.c.bf16 %v695_v21, %v693_v20  ;;  %v713_v20 = vld [vmem:[#allocation7 + $0x1a8] sm:$0xff] }
  0x92   :  { %1128 = vmatprep.subr.bf16.mxu1 %v1127_v56  ;;  %v680_v56 = vld [vmem:[#allocation7 + $0xa0] sm:$0xff]  ;;  %v1147_v62 = vpack.c.bf16 %v159_v53, %v155_v52  ;;  %1252 = vmatprep.subr.bf16.mxu0 %v1251_v55  ;;  %v179_v26 = vld [vmem:[#allocation5 + $0x398] sm:$0xff]  ;;  %v694_v31 = vld [vmem:[#allocation7 + $0x110] sm:$0xff] }
  0x93   :  { %v1253_v3 = vpack.c.bf16 %v682_v57, %v680_v56  ;;  %v183_v27 = vld [vmem:[#allocation5 + $0x3b8] sm:$0xff]  ;;  %v178_v38 = vld [vmem:[#allocation5 + $0x390] sm:$0xff]  ;;  %v1265_v43 = vpack.c.bf16 %v694_v31, %v692_v30  ;;  %v700_v56 = vld [vmem:[#allocation7 + $0x140] sm:$0xff] }
  0x94   :  { %v699_v36 = vld [vmem:[#allocation7 + $0x138] sm:$0xff]  ;;  %v182_v39 = vld [vmem:[#allocation5 + $0x3b0] sm:$0xff] }
  0x95   :  { %1130 = vmatpush1.bf16.msra.mxu1 %v1129_v5  ;;  %v684_v5 = vld [vmem:[#allocation7 + $0xc0] sm:$0xff]  ;;  %1254 = vmatpush1.bf16.msra.mxu0 %v1253_v3  ;;  %v187_v40 = vld [vmem:[#allocation5 + $0x3d8] sm:$0xff]  ;;  %v1267_v44 = vpack.c.bf16 %v699_v36, %v697_v35  ;;  %v698_v46 = vld [vmem:[#allocation7 + $0x130] sm:$0xff] }
  0x96   :  { %1132 = vmatprep.subr.bf16.mxu1 %v1131_v10  ;;  %v1151_v10 = vpack.c.bf16 %v167_v2, %v163_v1  ;;  %v1257_v15 = vpack.c.bf16 %v686_v6, %v684_v5  ;;  %1256 = vmatprep.subr.bf16.mxu0 %v1255_v4  ;;  %v191_v42 = vld [vmem:[#allocation5 + $0x3f8] sm:$0xff]  ;;  %v186_v50 = vld [vmem:[#allocation5 + $0x3d0] sm:$0xff]  ;;  %v1269_v54 = vpack.c.bf16 %v698_v46, %v696_v45  ;;  %v704_v5 = vld [vmem:[#allocation7 + $0x160] sm:$0xff] }
  0x97   :  { %v703_v48 = vld [vmem:[#allocation7 + $0x158] sm:$0xff]  ;;  %v190_v51 = vld [vmem:[#allocation5 + $0x3f0] sm:$0xff] }
  0x98   :  { %v195_v52 = vld [vmem:[#allocation5 + $0x418] sm:$0xff]  ;;  %v1271_v55 = vpack.c.bf16 %v703_v48, %v701_v33  ;;  %v702_v57 = vld [vmem:[#allocation7 + $0x150] sm:$0xff] }
  0x99   :  { %1134 = vmatpush1.bf16.msra.mxu1 %v1133_v19  ;;  %v1153_v19 = vpack.c.bf16 %v166_v12, %v162_v11  ;;  %1258 = vmatpush1.bf16.msra.mxu0 %v1257_v15  ;;  %v199_v53 = vld [vmem:[#allocation5 + $0x438] sm:$0xff]  ;;  %v194_v63 = vld [vmem:[#allocation5 + $0x410] sm:$0xff]  ;;  %v1273_v3 = vpack.c.bf16 %v702_v57, %v700_v56  ;;  %v717_v56 = vld [vmem:[#allocation7 + $0x1c8] sm:$0xff] }
  0x9a   :  { %1136 = vmatprep.subr.bf16.mxu1 %v1135_v22  ;;  %v1155_v22 = vpack.c.bf16 %v175_v14, %v171_v13  ;;  %1260 = vmatprep.subr.bf16.mxu0 %v1259_v16  ;;  %v707_v60 = vld [vmem:[#allocation7 + $0x178] sm:$0xff]  ;;  %v198_v0 = vld [vmem:[#allocation5 + $0x430] sm:$0xff] }
  0x9b   :  { %v203_v1 = vld [vmem:[#allocation5 + $0x458] sm:$0xff]  ;;  %v1275_v4 = vpack.c.bf16 %v707_v60, %v705_v59  ;;  %v706_v6 = vld [vmem:[#allocation7 + $0x170] sm:$0xff]  ;;  %v716_v60 = vld [vmem:[#allocation7 + $0x1c0] sm:$0xff] }
  0x9c   :  { %v207_v2 = vld [vmem:[#allocation5 + $0x478] sm:$0xff]  ;;  %v202_v11 = vld [vmem:[#allocation5 + $0x450] sm:$0xff]  ;;  %v1277_v15 = vpack.c.bf16 %v706_v6, %v704_v5  ;;  %v721_v5 = vld [vmem:[#allocation7 + $0x1e8] sm:$0xff] }
  0x9d   :  { %1138 = vmatpush1.bf16.msra.mxu1 %v1137_v32  ;;  %v1157_v32 = vpack.c.bf16 %v174_v24, %v170_v23  ;;  %1262 = vmatpush1.bf16.msra.mxu0 %v1261_v28  ;;  %v711_v9 = vld [vmem:[#allocation7 + $0x198] sm:$0xff]  ;;  %v206_v12 = vld [vmem:[#allocation5 + $0x470] sm:$0xff] }
  0x9e   :  { %1140 = vmatprep.subr.bf16.mxu1 %v1139_v37  ;;  %v1159_v37 = vpack.c.bf16 %v183_v27, %v179_v26  ;;  %1264 = vmatprep.subr.bf16.mxu0 %v1263_v29  ;;  %v211_v13 = vld [vmem:[#allocation5 + $0x498] sm:$0xff]  ;;  %v1279_v16 = vpack.c.bf16 %v711_v9, %v709_v8  ;;  %v710_v18 = vld [vmem:[#allocation7 + $0x190] sm:$0xff]  ;;  %v712_v29 = vld [vmem:[#allocation7 + $0x1a0] sm:$0xff] }
  0x9f   :  { %v215_v14 = vld [vmem:[#allocation5 + $0x4b8] sm:$0xff]  ;;  %v210_v23 = vld [vmem:[#allocation5 + $0x490] sm:$0xff]  ;;  %v1281_v28 = vpack.c.bf16 %v710_v18, %v708_v17  ;;  %v720_v9 = vld [vmem:[#allocation7 + $0x1e0] sm:$0xff] }
  0xa0   :  { %v715_v21 = vld [vmem:[#allocation7 + $0x1b8] sm:$0xff]  ;;  %v214_v24 = vld [vmem:[#allocation5 + $0x4b0] sm:$0xff] }
  0xa1   :  { %1142 = vmatpush1.bf16.msra.mxu1 %v1141_v47  ;;  %v1161_v47 = vpack.c.bf16 %v182_v39, %v178_v38  ;;  %1266 = vmatpush1.bf16.msra.mxu0 %v1265_v43  ;;  %v219_v26 = vld [vmem:[#allocation5 + $0x4d8] sm:$0xff]  ;;  %v714_v30 = vld [vmem:[#allocation7 + $0x1b0] sm:$0xff]  ;;  %v1177_v31 = vpack.c.bf16 %v214_v24, %v210_v23 }
  0xa2   :  { %1144 = vmatprep.subr.bf16.mxu1 %v1143_v49  ;;  %v1163_v49 = vpack.c.bf16 %v191_v42, %v187_v40  ;;  %1268 = vmatprep.subr.bf16.mxu0 %v1267_v44  ;;  %v223_v27 = vld [vmem:[#allocation5 + $0x4f8] sm:$0xff]  ;;  %v218_v35 = vld [vmem:[#allocation5 + $0x4d0] sm:$0xff]  ;;  %v1285_v38 = vpack.c.bf16 %v714_v30, %v712_v29 }
  0xa3   :  { %v227_v36 = vld [vmem:[#allocation5 + $0x518] sm:$0xff]  ;;  %v226_v42 = vld [vmem:[#allocation5 + $0x510] sm:$0xff] }
  0xa4   :  { %v230_v43 = vld [vmem:[#allocation5 + $0x530] sm:$0xff]  ;;  %v235_v44 = vld [vmem:[#allocation5 + $0x558] sm:$0xff] }
  0xa5   :  { %1146 = vmatpush1.bf16.msra.mxu1 %v1145_v58  ;;  %v1165_v58 = vpack.c.bf16 %v190_v51, %v186_v50  ;;  %1270 = vmatpush1.bf16.msra.mxu0 %v1269_v54  ;;  %v239_v45 = vld [vmem:[#allocation5 + $0x578] sm:$0xff]  ;;  %v1185_v46 = vpack.c.bf16 %v230_v43, %v226_v42  ;;  %v234_v33 = vld [vmem:[#allocation5 + $0x550] sm:$0xff] }
  0xa6   :  { %1148 = vmatprep.subr.bf16.mxu1 %v1147_v62  ;;  %v1167_v62 = vpack.c.bf16 %v199_v53, %v195_v52  ;;  %1272 = vmatprep.subr.bf16.mxu0 %v1271_v55  ;;  %v238_v48 = vld [vmem:[#allocation5 + $0x570] sm:$0xff]  ;;  %v247_v50 = vld [vmem:[#allocation5 + $0x5b8] sm:$0xff] }
  0xa7   :  { %v1189_v51 = vpack.c.bf16 %v238_v48, %v234_v33  ;;  %v242_v52 = vld [vmem:[#allocation5 + $0x590] sm:$0xff]  ;;  %v251_v55 = vld [vmem:[#allocation5 + $0x5d8] sm:$0xff] }
  0xa8   :  { %v246_v53 = vld [vmem:[#allocation5 + $0x5b0] sm:$0xff]  ;;  %v719_v57 = vld [vmem:[#allocation7 + $0x1d8] sm:$0xff] }
  0xa9   :  { %1150 = vmatpush1.bf16.msra.mxu1 %v1149_v7  ;;  %v1169_v7 = vpack.c.bf16 %v198_v0, %v194_v63  ;;  %1274 = vmatpush1.bf16.msra.mxu0 %v1273_v3  ;;  %v1287_v59 = vpack.c.bf16 %v719_v57, %v717_v56  ;;  %v1193_v0 = vpack.c.bf16 %v246_v53, %v242_v52  ;;  %v723_v6 = vld [vmem:[#allocation7 + $0x1f8] sm:$0xff]  ;;  %v270_v23 = vld [vmem:[#allocation5 + $0x670] sm:$0xff] }
  0xaa   :  { %1152 = vmatprep.subr.bf16.mxu1 %v1151_v10  ;;  %v1171_v10 = vpack.c.bf16 %v207_v2, %v203_v1  ;;  %1276 = vmatprep.subr.bf16.mxu0 %v1275_v4  ;;  %v250_v1 = vld [vmem:[#allocation5 + $0x5d0] sm:$0xff]  ;;  %v259_v4 = vld [vmem:[#allocation5 + $0x618] sm:$0xff]  ;;  %v1291_v8 = vpack.c.bf16 %v723_v6, %v721_v5 }
  0xab   :  { %v254_v2 = vld [vmem:[#allocation5 + $0x5f0] sm:$0xff]  ;;  %v271_v17 = vld [vmem:[#allocation5 + $0x678] sm:$0xff] }
  0xac   :  { %v274_v29 = vld [vmem:[#allocation5 + $0x690] sm:$0xff]  ;;  %v315_v56 = vld [vmem:[#allocation5 + $0x7d8] sm:$0xff] }
  0xad   :  { %1154 = vmatpush1.bf16.msra.mxu1 %v1153_v19  ;;  %v1173_v19 = vpack.c.bf16 %v206_v12, %v202_v11  ;;  %1278 = vmatpush1.bf16.msra.mxu0 %v1277_v15  ;;  %v1197_v12 = vpack.c.bf16 %v254_v2, %v250_v1  ;;  %v262_v15 = vld [vmem:[#allocation5 + $0x630] sm:$0xff]  ;;  %v319_v57 = vld [vmem:[#allocation5 + $0x7f8] sm:$0xff]  ;;  %v328_v2 = vsub.s32 1, %v1581_v61 }
  0xae   :  { %1156 = vmatprep.subr.bf16.mxu1 %v1155_v22  ;;  %v1175_v22 = vpack.c.bf16 %v215_v14, %v211_v13  ;;  %1280 = vmatprep.subr.bf16.mxu0 %v1279_v16  ;;  %v258_v14 = vld [vmem:[#allocation5 + $0x610] sm:$0xff]  ;;  %v267_v16 = vld [vmem:[#allocation5 + $0x658] sm:$0xff] }
  0xaf   :  { %v1201_v18 = vpack.c.bf16 %v262_v15, %v258_v14  ;;  %v278_v30 = vld [vmem:[#allocation5 + $0x6b0] sm:$0xff]  ;;  %v1608_v1 = vld [vmem:[%s1654_s2] sm:$0xf]  ;;  %v729_v15 = vld [vmem:[#allocation7 + $0x228] sm:$0xff] }
  0xb0   :  { %v290_v43 = vld [vmem:[#allocation5 + $0x710] sm:$0xff] }
  0xb1   :  { %1158 = vmatpush1.bf16.msra.mxu1 %v1157_v32  ;;  %v1179_v32 = vpack.c.bf16 %v223_v27, %v219_v26  ;;  %1282 = vmatpush1.bf16.msra.mxu0 %v1281_v28  ;;  %v275_v26 = vld [vmem:[#allocation5 + $0x698] sm:$0xff]  ;;  %v298_v48 = vld [vmem:[#allocation5 + $0x750] sm:$0xff] }
  0xb2   :  { %1160 = vmatprep.subr.bf16.mxu1 %v1159_v37  ;;  %v231_v37 = vld [vmem:[#allocation5 + $0x538] sm:$0xff] }
  0xb3   :  { %v1183_v40 = vpack.c.bf16 %v231_v37, %v227_v36  ;;  %v279_v27 = vld [vmem:[#allocation5 + $0x6b8] sm:$0xff]  ;;  %v282_v36 = vld [vmem:[#allocation5 + $0x6d0] sm:$0xff] }
  0xb4   :  { %v286_v37 = vld [vmem:[#allocation5 + $0x6f0] sm:$0xff] }
  0xb5   :  { %1162 = vmatpush1.bf16.msra.mxu1 %v1161_v47  ;;  %v1187_v47 = vpack.c.bf16 %v239_v45, %v235_v44  ;;  %v294_v44 = vld [vmem:[#allocation5 + $0x730] sm:$0xff]  ;;  %v299_v45 = vld [vmem:[#allocation5 + $0x758] sm:$0xff] }
  0xb6   :  { %1164 = vmatprep.subr.bf16.mxu1 %v1163_v49  ;;  %v243_v49 = vld [vmem:[#allocation5 + $0x598] sm:$0xff] }
  0xb7   :  { %v1191_v54 = vpack.c.bf16 %v247_v50, %v243_v49  ;;  %v302_v49 = vld [vmem:[#allocation5 + $0x770] sm:$0xff]  ;;  %v307_v50 = vld [vmem:[#allocation5 + $0x798] sm:$0xff] }
  0xb8   :  { %v1221_v52 = vpack.c.bf16 %v302_v49, %v298_v48  ;;  %v746_v48 = vld [vmem:[#allocation7 + $0x2b0] sm:$0xff]  ;;  %v749_v49 = vld [vmem:[#allocation7 + $0x2c8] sm:$0xff] }
  0xb9   :  { %1166 = vmatpush1.bf16.msra.mxu1 %v1165_v58  ;;  %v255_v58 = vld [vmem:[#allocation5 + $0x5f8] sm:$0xff] }
  0xba   :  { %1168 = vmatprep.subr.bf16.mxu1 %v1167_v62  ;;  %v718_v62 = vld [vmem:[#allocation7 + $0x1d0] sm:$0xff]  ;;  %v1195_v3 = vpack.c.bf16 %v255_v58, %v251_v55 }
  0xbb   :  { %v1289_v63 = vpack.c.bf16 %v718_v62, %v716_v60  ;;  %v310_v55 = vld [vmem:[#allocation5 + $0x7b0] sm:$0xff] }
  0xbc   :  { %571 = vmatmul.mubr.f32.vlgmr.msra.gmra.mrb[2].mxu1 %v1584_v25  ;;  %v1283_v25 = vpack.c.bf16 %v715_v21, %v713_v20  ;;  %v727_v20 = vld [vmem:[#allocation7 + $0x218] sm:$0xff]  ;;  %v1203_v21 = vpack.c.bf16 %v271_v17, %v267_v16  ;;  %v314_v60 = vld [vmem:[#allocation5 + $0x7d0] sm:$0xff] }
  0xbd   :  { %1170 = vmatpush1.bf16.msra.mxu1 %v1169_v7  ;;  %641 = vmatprep.mubr.f32.mxu1 %v1595_v41  ;;  %v222_v41 = vld [vmem:[#allocation5 + $0x4f0] sm:$0xff]  ;;  %v263_v7 = vld [vmem:[#allocation5 + $0x638] sm:$0xff] }
  0xbe   :  { %1172 = vmatprep.subr.bf16.mxu1 %v1171_v10  ;;  %1284 = vmatprep.subr.bf16.mxu0 %v1283_v25  ;;  %v1181_v39 = vpack.c.bf16 %v222_v41, %v218_v35  ;;  %v722_v10 = vld [vmem:[#allocation7 + $0x1f0] sm:$0xff]  ;;  %v1199_v13 = vpack.c.bf16 %v263_v7, %v259_v4  ;;  %v1207_v25 = vpack.c.bf16 %v279_v27, %v275_v26  ;;  %v731_v16 = vld [vmem:[#allocation7 + $0x238] sm:$0xff] }
  0xbf   :  { %1286 = vmatpush1.bf16.msra.mxu0 %v1285_v38  ;;  %v1293_v11 = vpack.c.bf16 %v722_v10, %v720_v9  ;;  %v1209_v35 = vpack.c.bf16 %v278_v30, %v274_v29  ;;  %v291_v38 = vld [vmem:[#allocation5 + $0x718] sm:$0xff]  ;;  %v318_v62 = vld [vmem:[#allocation5 + $0x7f0] sm:$0xff]  ;;  %v329_v4 = vrot.slane %v1608_v1, %v328_v2  ;;  %v737_v30 = vld [vmem:[#allocation7 + $0x268] sm:$0xff] }
  0xc0   :  { %1288 = vmatprep.subr.bf16.mxu0 %v1287_v59  ;;  %v1227_v59 = vpack.c.bf16 %v319_v57, %v315_v56  ;;  %v735_v26 = vld [vmem:[#allocation7 + $0x258] sm:$0xff]  ;;  %v734_v29 = vld [vmem:[#allocation7 + $0x250] sm:$0xff] }
  0xc1   :  { %1174 = vmatpush1.bf16.msra.mxu1 %v1173_v19  ;;  %v725_v19 = vld [vmem:[#allocation7 + $0x208] sm:$0xff]  ;;  %v755_v56 = vld [vmem:[#allocation7 + $0x2f8] sm:$0xff] }
  0xc2   :  { %1176 = vmatprep.subr.bf16.mxu1 %v1175_v22  ;;  %v266_v22 = vld [vmem:[#allocation5 + $0x650] sm:$0xff]  ;;  %v1295_v24 = vpack.c.bf16 %v727_v20, %v725_v19  ;;  %v1299_v20 = vpack.c.bf16 %v731_v16, %v729_v15  ;;  %v764_v16 = vld [vmem:[#allocation7 + $0x340] sm:$0xff] }
  0xc3   :  { %1290 = vmatpush1.bf16.msra.mxu0 %v1289_v63  ;;  %v1205_v28 = vpack.c.bf16 %v270_v23, %v266_v22  ;;  %v1229_v63 = vpack.c.bf16 %v318_v62, %v314_v60  ;;  %v730_v22 = vld [vmem:[#allocation7 + $0x230] sm:$0xff]  ;;  %v757_v62 = vld [vmem:[#allocation7 + $0x308] sm:$0xff] }
  0xc4   :  { %1292 = vmatprep.subr.bf16.mxu0 %v1291_v8  ;;  %v754_v60 = vld [vmem:[#allocation7 + $0x2f0] sm:$0xff] }
  0xc5   :  { %1178 = vmatpush1.bf16.msra.mxu1 %v1177_v31  ;;  %v283_v31 = vld [vmem:[#allocation5 + $0x6d8] sm:$0xff] }
  0xc6   :  { %1180 = vmatprep.subr.bf16.mxu1 %v1179_v32  ;;  %v287_v32 = vld [vmem:[#allocation5 + $0x6f8] sm:$0xff] }
  0xc7   :  { %1294 = vmatpush1.bf16.msra.mxu0 %v1293_v11  ;;  %v1211_v41 = vpack.c.bf16 %v287_v32, %v283_v31  ;;  %v739_v31 = vld [vmem:[#allocation7 + $0x278] sm:$0xff] }
  0xc8   :  { %1296 = vmatprep.subr.bf16.mxu0 %v1295_v24  ;;  %v733_v24 = vld [vmem:[#allocation7 + $0x248] sm:$0xff] }
  0xc9   :  { %1182 = vmatpush1.bf16.msra.mxu1 %v1181_v39  ;;  %v295_v39 = vld [vmem:[#allocation5 + $0x738] sm:$0xff] }
  0xca   :  { %1184 = vmatprep.subr.bf16.mxu1 %v1183_v40  ;;  %v1213_v40 = vpack.c.bf16 %v286_v37, %v282_v36  ;;  %v1215_v42 = vpack.c.bf16 %v295_v39, %v291_v38  ;;  %v738_v36 = vld [vmem:[#allocation7 + $0x270] sm:$0xff]  ;;  %v741_v37 = vld [vmem:[#allocation7 + $0x288] sm:$0xff]  ;;  %v743_v38 = vld [vmem:[#allocation7 + $0x298] sm:$0xff] }
  0xcd   :  { %1186 = vmatpush1.bf16.msra.mxu1 %v1185_v46  ;;  %v303_v46 = vld [vmem:[#allocation5 + $0x778] sm:$0xff] }
  0xce   :  { %1188 = vmatprep.subr.bf16.mxu1 %v1187_v47  ;;  %v1217_v47 = vpack.c.bf16 %v294_v44, %v290_v43  ;;  %v1219_v33 = vpack.c.bf16 %v303_v46, %v299_v45  ;;  %v742_v43 = vld [vmem:[#allocation7 + $0x290] sm:$0xff]  ;;  %v745_v44 = vld [vmem:[#allocation7 + $0x2a8] sm:$0xff]  ;;  %v747_v45 = vld [vmem:[#allocation7 + $0x2b8] sm:$0xff] }
  0xd1   :  { %1190 = vmatpush1.bf16.msra.mxu1 %v1189_v51  ;;  %v311_v51 = vld [vmem:[#allocation5 + $0x7b8] sm:$0xff] }
  0xd2   :  { %1192 = vmatprep.subr.bf16.mxu1 %v1191_v54  ;;  %v1223_v53 = vpack.c.bf16 %v311_v51, %v307_v50  ;;  %v306_v54 = vld [vmem:[#allocation5 + $0x790] sm:$0xff]  ;;  %v751_v50 = vld [vmem:[#allocation7 + $0x2d8] sm:$0xff] }
  0xd3   :  { %v1225_v58 = vpack.c.bf16 %v310_v55, %v306_v54  ;;  %v750_v54 = vld [vmem:[#allocation7 + $0x2d0] sm:$0xff]  ;;  %v753_v55 = vld [vmem:[#allocation7 + $0x2e8] sm:$0xff] }
  0xd5   :  { %1194 = vmatpush1.bf16.msra.mxu1 %v1193_v0  ;;  %v324_v0 = vsub.s32 0, %v1581_v61 }
  0xd6   :  { %1196 = vmatprep.subr.bf16.mxu1 %v1195_v3 }
  0xd7   :  { %v325_v3 = vrot.slane %v1608_v1, %v324_v0 }
  0xd9   :  { %1198 = vmatpush1.bf16.msra.mxu1 %v1197_v12  ;;  %v724_v12 = vld [vmem:[#allocation7 + $0x200] sm:$0xff] }
  0xda   :  { %1200 = vmatprep.subr.bf16.mxu1 %v1199_v13  ;;  %v726_v13 = vld [vmem:[#allocation7 + $0x210] sm:$0xff] }
  0xdd   :  { %1202 = vmatpush1.bf16.msra.mxu1 %v1201_v18  ;;  %v1297_v18 = vpack.c.bf16 %v726_v13, %v724_v12  ;;  %v765_v12 = vld [vmem:[#allocation7 + $0x348] sm:$0xff]  ;;  %v767_v13 = vld [vmem:[#allocation7 + $0x358] sm:$0xff] }
  0xde   :  { %1204 = vmatprep.subr.bf16.mxu1 %v1203_v21  ;;  %v728_v21 = vld [vmem:[#allocation7 + $0x220] sm:$0xff]  ;;  %v1335_v15 = vpack.c.bf16 %v767_v13, %v765_v12 }
  0xdf   :  { %v1301_v27 = vpack.c.bf16 %v730_v22, %v728_v21  ;;  %v768_v22 = vld [vmem:[#allocation7 + $0x360] sm:$0xff] }
  0xe1   :  { %1206 = vmatpush1.bf16.msra.mxu1 %v1205_v28  ;;  %v1303_v28 = vpack.c.bf16 %v735_v26, %v733_v24  ;;  %v773_v24 = vld [vmem:[#allocation7 + $0x388] sm:$0xff]  ;;  %v775_v26 = vld [vmem:[#allocation7 + $0x398] sm:$0xff] }
  0xe2   :  { %1208 = vmatprep.subr.bf16.mxu1 %v1207_v25  ;;  %v732_v25 = vld [vmem:[#allocation7 + $0x240] sm:$0xff] }
  0xe3   :  { %v1305_v32 = vpack.c.bf16 %v734_v29, %v732_v25  ;;  %v772_v25 = vld [vmem:[#allocation7 + $0x380] sm:$0xff]  ;;  %v774_v29 = vld [vmem:[#allocation7 + $0x390] sm:$0xff] }
  0xe5   :  { %1210 = vmatpush1.bf16.msra.mxu1 %v1209_v35  ;;  %v1307_v35 = vpack.c.bf16 %v739_v31, %v737_v30  ;;  %v777_v30 = vld [vmem:[#allocation7 + $0x3a8] sm:$0xff]  ;;  %v779_v31 = vld [vmem:[#allocation7 + $0x3b8] sm:$0xff] }
  0xe6   :  { %1212 = vmatprep.subr.bf16.mxu1 %v1211_v41  ;;  %v736_v41 = vld [vmem:[#allocation7 + $0x260] sm:$0xff] }
  0xe7   :  { %v1309_v39 = vpack.c.bf16 %v738_v36, %v736_v41  ;;  %v776_v41 = vld [vmem:[#allocation7 + $0x3a0] sm:$0xff]  ;;  %v778_v36 = vld [vmem:[#allocation7 + $0x3b0] sm:$0xff] }
  0xe9   :  { %1214 = vmatpush1.bf16.msra.mxu1 %v1213_v40  ;;  %v1311_v40 = vpack.c.bf16 %v743_v38, %v741_v37  ;;  %v781_v37 = vld [vmem:[#allocation7 + $0x3c8] sm:$0xff]  ;;  %v783_v38 = vld [vmem:[#allocation7 + $0x3d8] sm:$0xff] }
  0xea   :  { %1216 = vmatprep.subr.bf16.mxu1 %v1215_v42  ;;  %v740_v42 = vld [vmem:[#allocation7 + $0x280] sm:$0xff] }
  0xeb   :  { %v1313_v46 = vpack.c.bf16 %v742_v43, %v740_v42  ;;  %v780_v42 = vld [vmem:[#allocation7 + $0x3c0] sm:$0xff]  ;;  %v782_v43 = vld [vmem:[#allocation7 + $0x3d0] sm:$0xff] }
  0xed   :  { %1218 = vmatpush1.bf16.msra.mxu1 %v1217_v47  ;;  %v1315_v47 = vpack.c.bf16 %v747_v45, %v745_v44  ;;  %v785_v44 = vld [vmem:[#allocation7 + $0x3e8] sm:$0xff]  ;;  %v787_v45 = vld [vmem:[#allocation7 + $0x3f8] sm:$0xff] }
  0xee   :  { %1220 = vmatprep.subr.bf16.mxu1 %v1219_v33  ;;  %v744_v33 = vld [vmem:[#allocation7 + $0x2a0] sm:$0xff] }
  0xef   :  { %v1317_v51 = vpack.c.bf16 %v746_v48, %v744_v33  ;;  %v784_v33 = vld [vmem:[#allocation7 + $0x3e0] sm:$0xff]  ;;  %v786_v48 = vld [vmem:[#allocation7 + $0x3f0] sm:$0xff] }
  0xf1   :  { %1222 = vmatpush1.bf16.msra.mxu1 %v1221_v52  ;;  %v1319_v52 = vpack.c.bf16 %v751_v50, %v749_v49  ;;  %v1357_v49 = vpack.c.bf16 %v786_v48, %v784_v33  ;;  %v332_v50 = vsub.s32 2, %v1581_v61 }
  0xf2   :  { %1224 = vmatprep.subr.bf16.mxu1 %v1223_v53  ;;  %v748_v53 = vld [vmem:[#allocation7 + $0x2c0] sm:$0xff] }
  0xf3   :  { %v1321_v57 = vpack.c.bf16 %v750_v54, %v748_v53 }
  0xf5   :  { %1226 = vmatpush1.bf16.msra.mxu1 %v1225_v58  ;;  %v1323_v58 = vpack.c.bf16 %v755_v56, %v753_v55 }
  0xf6   :  { %1228 = vmatprep.subr.bf16.mxu1 %v1227_v59  ;;  %v752_v59 = vld [vmem:[#allocation7 + $0x2e0] sm:$0xff] }
  0xf9   :  { %1230 = vmatpush1.bf16.msra.mxu1 %v1229_v63  ;;  %v759_v63 = vld [vmem:[#allocation7 + $0x318] sm:$0xff] }
  0xfc   :  { %642 = vmatmul.mubr.f32.vlgmr.msra.gmra.mrb[2].mxu1 %v1590_v34 }
 0x14f   :  { %v430_v5 = vpop.f32.mrb[0].mxu1 }
 0x150   :  { %v431_v6 = vadd.f32 %v430_v5, %v325_v3  ;;  %v432_v34 = vpop.f32.mrb[1].mxu1  ;;  %v1325_v3 = vpack.c.bf16 %v754_v60, %v752_v59  ;;  %v756_v5 = vld [vmem:[#allocation7 + $0x300] sm:$0xff] }
 0x151   :  { %v501_v7 = vpop.f32.mrb[0].mxu0  ;;  %v433_v8 = vadd.f32 %v432_v34, %v329_v4  ;;  %v1327_v4 = vpack.c.bf16 %v759_v63, %v757_v62  ;;  %v761_v34 = vld [vmem:[#allocation7 + $0x328] sm:$0xff]  ;;  %v788_v63 = vld [vmem:[%s1656_s4] sm:$0x3] }
 0x152   :  { %v503_v9 = vpop.f32.mrb[1].mxu0  ;;  %v502_v10 = vadd.f32 %v501_v7, %v431_v6  ;;  %v758_v6 = vld [vmem:[#allocation7 + $0x310] sm:$0xff]  ;;  %v763_v7 = vld [vmem:[#allocation7 + $0x338] sm:$0xff] }
 0x153   :  { %v504_v11 = vadd.f32 %v503_v9, %v433_v8  ;;  %v1329_v8 = vpack.c.bf16 %v758_v6, %v756_v5  ;;  %v1331_v9 = vpack.c.bf16 %v763_v7, %v761_v34 }
 0x154   :  { %v652_v14 = vmul.f32 0.2, %v502_v10  ;;  %vm648_vm0 = vcmp.ge.f32.partialorder %v502_v10, 0.0 }
 0x155   :  { %v653_v17 = vmul.f32 0.2, %v504_v11  ;;  %vm649_vm1 = vcmp.ge.f32.partialorder %v504_v11, 0.0 }
 0x156   :  { %v656_v23 = vsel %vm648_vm0, %v502_v10, %v652_v14  ;;  %v760_v10 = vld [vmem:[#allocation7 + $0x320] sm:$0xff] }
 0x157   :  { %v657_v19 = vsel %vm649_vm1, %v504_v11, %v653_v17  ;;  %v762_v11 = vld [vmem:[#allocation7 + $0x330] sm:$0xff] }
 0x158   :  { %864 = vmatprep.mubr.f32.mxu0 %v657_v19  ;;  %v1333_v14 = vpack.c.bf16 %v762_v11, %v760_v10  ;;  %v766_v17 = vld [vmem:[#allocation7 + $0x350] sm:$0xff]  ;;  %v771_v19 = vld [vmem:[#allocation7 + $0x378] sm:$0xff] }
 0x159   :  { %865 = vmatmul.mubr.f32.vlgmr.msra.gmra.mrb[2].mxu0 %v656_v23  ;;  %v770_v23 = vld [vmem:[#allocation7 + $0x370] sm:$0xff] }
 0x15a   :  { %1298 = vmatpush1.bf16.msra.mxu0 %v1297_v18  ;;  %v769_v18 = vld [vmem:[#allocation7 + $0x368] sm:$0xff] }
 0x15b   :  { %1300 = vmatprep.subr.bf16.mxu0 %v1299_v20  ;;  %v1337_v20 = vpack.c.bf16 %v766_v17, %v764_v16  ;;  %v1339_v21 = vpack.c.bf16 %v771_v19, %v769_v18 }
 0x15e   :  { %1302 = vmatpush1.bf16.msra.mxu0 %v1301_v27  ;;  %v1341_v27 = vpack.c.bf16 %v770_v23, %v768_v22 }
 0x15f   :  { %1304 = vmatprep.subr.bf16.mxu0 %v1303_v28  ;;  %v1343_v28 = vpack.c.bf16 %v775_v26, %v773_v24 }
 0x162   :  { %1306 = vmatpush1.bf16.msra.mxu0 %v1305_v32  ;;  %v1345_v32 = vpack.c.bf16 %v774_v29, %v772_v25 }
 0x163   :  { %1308 = vmatprep.subr.bf16.mxu0 %v1307_v35  ;;  %v1347_v35 = vpack.c.bf16 %v779_v31, %v777_v30 }
 0x166   :  { %1310 = vmatpush1.bf16.msra.mxu0 %v1309_v39  ;;  %v1349_v39 = vpack.c.bf16 %v778_v36, %v776_v41 }
 0x167   :  { %1312 = vmatprep.subr.bf16.mxu0 %v1311_v40  ;;  %v1351_v40 = vpack.c.bf16 %v783_v38, %v781_v37 }
 0x16a   :  { %1314 = vmatpush1.bf16.msra.mxu0 %v1313_v46  ;;  %v1353_v46 = vpack.c.bf16 %v782_v43, %v780_v42 }
 0x16b   :  { %1316 = vmatprep.subr.bf16.mxu0 %v1315_v47  ;;  %v1355_v47 = vpack.c.bf16 %v787_v45, %v785_v44 }
 0x16e   :  { %1318 = vmatpush1.bf16.msra.mxu0 %v1317_v51  ;;  %v336_v51 = vsub.s32 3, %v1581_v61 }
 0x16f   :  { %1320 = vmatprep.subr.bf16.mxu0 %v1319_v52  ;;  %v333_v52 = vrot.slane %v1608_v1, %v332_v50 }
 0x170   :  { %v337_v53 = vrot.slane %v1608_v1, %v336_v51  ;;  %v797_v1 = vrot.slane %v788_v63, %v328_v2 }
 0x172   :  { %1322 = vmatpush1.bf16.msra.mxu0 %v1321_v57 }
 0x173   :  { %1324 = vmatprep.subr.bf16.mxu0 %v1323_v58 }
 0x176   :  { %1326 = vmatpush1.bf16.msra.mxu0 %v1325_v3  ;;  %v793_v3 = vrot.slane %v788_v63, %v324_v0 }
 0x177   :  { %1328 = vmatprep.subr.bf16.mxu0 %v1327_v4 }
 0x17a   :  { %1330 = vmatpush1.bf16.msra.mxu0 %v1329_v8 }
 0x17b   :  { %1332 = vmatprep.subr.bf16.mxu0 %v1331_v9 }
 0x17e   :  { %1334 = vmatpush1.bf16.msra.mxu0 %v1333_v14 }
 0x17f   :  { %1336 = vmatprep.subr.bf16.mxu0 %v1335_v15 }
 0x182   :  { %1338 = vmatpush1.bf16.msra.mxu0 %v1337_v20 }
 0x183   :  { %1340 = vmatprep.subr.bf16.mxu0 %v1339_v21 }
 0x186   :  { %1342 = vmatpush1.bf16.msra.mxu0 %v1341_v27 }
 0x187   :  { %1344 = vmatprep.subr.bf16.mxu0 %v1343_v28 }
 0x18a   :  { %1346 = vmatpush1.bf16.msra.mxu0 %v1345_v32 }
 0x18b   :  { %1348 = vmatprep.subr.bf16.mxu0 %v1347_v35 }
 0x18e   :  { %1350 = vmatpush1.bf16.msra.mxu0 %v1349_v39 }
 0x18f   :  { %1352 = vmatprep.subr.bf16.mxu0 %v1351_v40 }
 0x192   :  { %1354 = vmatpush1.bf16.msra.mxu0 %v1353_v46 }
 0x193   :  { %1356 = vmatprep.subr.bf16.mxu0 %v1355_v47 }
 0x196   :  { %1358 = vmatpush1.bf16.msra.mxu0 %v1357_v49 }
 0x1cf   :  { %v643_v54 = vpop.f32.mrb[2].mxu1 }
 0x1d0   :  { %v1363_v55 = vadd.f32 %v643_v54, %v333_v52  ;;  %v645_v56 = vpop.f32.mrb[3].mxu1 }
 0x1d1   :  { %v1364_v57 = vadd.f32 %v645_v56, %v337_v53 }
 0x1d2   :  { %v654_v58 = vmul.f32 0.2, %v1363_v55  ;;  %vm650_vm2 = vcmp.ge.f32.partialorder %v1363_v55, 0.0 }
 0x1d3   :  { %v655_v59 = vmul.f32 0.2, %v1364_v57  ;;  %vm651_vm3 = vcmp.ge.f32.partialorder %v1364_v57, 0.0 }
 0x1d4   :  { %v658_v62 = vsel %vm650_vm2, %v1363_v55, %v654_v58 }
 0x1d5   :  { %v659_v60 = vsel %vm651_vm3, %v1364_v57, %v655_v59 }
 0x1d6   :  { %935 = vmatprep.mubr.f32.mxu0 %v659_v60 }
 0x1d7   :  { %936 = vmatmul.mubr.f32.vlgmr.msra.gmra.mrb[2].mxu0 %v658_v62 }
 0x2aa   :  { %v937_v4 = vpop.f32.mrb[2].mxu0 }
 0x2ab   :  { %v1365_v5 = vadd.f32 %v937_v4, %v793_v3  ;;  %v939_v6 = vpop.f32.mrb[3].mxu0 }
 0x2ac   :  { %v1366_v34 = vadd.f32 %v939_v6, %v797_v1 }
 0x2ad   :  { %942 = vst [vmem:[#allocation8] sm:$0x3] %v1365_v5 }
 0x2ae   :  { %v943_v7 = vmax.f32 %v1366_v34, 0.0 }
 0x2af   :  { %1459 = shalt.err (!%p1456_p0)
}
 0x2b0   :  { %s1460_s19 = scalar_lea.hbm %s1657_s5, 32 }
 0x2b1   :  { %p1461_p1 = scmp.ne.s32.totalorder %s1657_s5, %s1460_s19  ;;  %p1464_p2 = scmp.lt.u32.totalorder %s1460_s19, %s1657_s5 }
 0x2b3   :  { %p1466_p3 = pnand %p1464_p2, %p1461_p1 }
 0x2b5   :  { %1469 = shalt.err (!%p1466_p3)
}
 0x2b6   :  { %954 = dma.vmem_to_hbm [thread:$0]  %s952_s14, 32, %s1657_s5, [#allocation4]   ;;  %944 = vst [vmem:[#allocation9] sm:$0x3] %v943_v7 }
 0x2b7   :  { %s1470_s25 = scalar_lea.vmem %s962_s16, 32  ;;  %p1475_p5 = scmp.lt.s32.totalorder %s962_s16, %s962_s16 }
 0x2b8   :  { %p1471_p4 = scmp.ne.s32.totalorder %s962_s16, %s1470_s25  ;;  %p1476_p6 = scmp.lt.s32.totalorder %s1470_s25, %s1470_s25 }
 0x2ba   :  { %p1477_p7 = por %p1476_p6, %p1475_p5 }
 0x2bc   :  { %p1478_p8 = pnand %p1477_p7, %p1471_p4 }
 0x2be   :  { %1481 = shalt.err (!%p1478_p8)
}
 0x2bf   :  { %s1482_s28 = scalar_lea.hbm %s1658_s6, 32 }
 0x2c0   :  { %p1483_p9 = scmp.ne.s32.totalorder %s1658_s6, %s1482_s28  ;;  %p1486_p10 = scmp.lt.u32.totalorder %s1482_s28, %s1658_s6 }
 0x2c2   :  { %p1488_p11 = pnand %p1486_p10, %p1483_p9 }
 0x2c4   :  { %1491 = shalt.err (!%p1488_p11)
}
 0x2c5   :  { %964 = dma.vmem_to_hbm [thread:$0]  %s962_s16, 32, %s1658_s6, [#allocation10]  }
 0x2c6   :  { %1496 = dma.done.wait [#allocation4], 32  }
 0x2c7   :  { %1497 = vsyncadd [#allocation4], 4294967264 }
 0x2c8   :  { %1498 = dma.done.wait [#allocation10], 32  }
 0x2c9   :  { %1499 = vsyncadd [#allocation10], 4294967264 }
 0x2ca   :  { %971 = vsyncpa [#allocation3], 1 }
 0x2cb   :  { %972 = vsyncpa [#allocation6], 1 }
 0x2cc   :  { %973 = vsyncpa [#allocation4], 1 }
 0x2cd   :  { %974 = vsyncpa [#allocation10], 1 }

</bundles_post_ra>
